<compile_context>
chip_gen: v7x
topology: tpu7x:2x2x1
jax: 0.10.0
libtpu: 0.0.40
codegen_flags: <defaults>
</compile_context>

<pallas_src>
import functools
import math

import jax
import jax.numpy as jnp
from jax import lax
from jax.experimental import pallas as pl
from jax.experimental.pallas import tpu as pltpu

# ----------------------- small synthetic ViT configuration -----------------------
B = 2              # batch
C = 3              # image channels
IMG = 16           # image height / width
PATCH = 8          # patch size
NP = (IMG // PATCH) ** 2          # number of patches = 4
S = NP + 1                        # sequence length (CLS + patches) = 5
D = 32             # hidden size
NH = 4             # attention heads
DH = D // NH       # head dim = 8
MLP = 64           # intermediate size
LAYERS = 2         # encoder layers
EMB = 16           # output embedding_dim of the projection head
LN_EPS = 1e-12     # HF ViT layer_norm_eps
DROPOUT_RATE = 0.6  # inference mode -> identity

CPP = C * PATCH * PATCH                 # flattened patch length = 192
ROWS = ((B * S + 7) // 8) * 8           # padded row count (sublane multiple) = 16
WCOLS = 3 * D + D + MLP                 # packed matrix-slab width = 192
VCOLS = 3 * D                           # packed vector-slab width = 96
OUT_LANES = 128                         # lane-dense padded output width
NEG = -1e4                              # additive mask; exp(NEG + tiny) == 0 in f32


# ------------------------------ fused forward kernel ------------------------------
def _dino_vit_kernel(patches_ref, wmats_ref, vecs_ref, table_ref, proj_ref, out_ref,
                     *, num_heads, n_layers, batch, seq, eps):
    f32 = jnp.float32
    r, cpp = patches_ref.shape
    d = table_ref.shape[1]
    mlp = wmats_ref.shape[1] - d
    dh = d // num_heads
    scale = 1.0 / math.sqrt(dh)

    def layer_norm(x, g, b):
        mu = jnp.mean(x, axis=-1, keepdims=True)
        var = jnp.mean((x - mu) ** 2, axis=-1, keepdims=True)
        return (x - mu) * lax.rsqrt(var + eps) * g + b

    # ---- patch embedding (conv-as-matmul) + additive (CLS + pos + conv-bias) table ----
    patch_w = table_ref[0:cpp, :]                              # (CPP, D)
    emb = table_ref[cpp:cpp + r, :]                            # (R, D), pad rows are 0
    h = jnp.dot(patches_ref[...], patch_w, preferred_element_type=f32) + emb

    # ---- block-diagonal attention mask, built in-kernel (no dense mask input) ----
    row = lax.broadcasted_iota(jnp.int32, (r, r), 0)
    col = lax.broadcasted_iota(jnp.int32, (r, r), 1)

    def seg(idx):
        s = jnp.full_like(idx, batch)          # pad rows share their own segment id
        for b in range(batch - 1, -1, -1):
            s = jnp.where(idx < (b + 1) * seq, b, s)
        return s

    attn_bias = jnp.where(seg(row) == seg(col), 0.0, NEG).astype(f32)   # (R, R)

    for l in range(n_layers):
        wm = wmats_ref[l]                      # (D+MLP, 3D+D+MLP) packed matrices
        vv = vecs_ref[l]                       # (8, 3D) packed vectors
        wqkv = wm[0:d, 0:3 * d]                # (D, 3D)
        wo = wm[0:d, 3 * d:4 * d]              # (D, D)
        w1 = wm[0:d, 4 * d:4 * d + mlp]        # (D, MLP)
        w2 = wm[d:d + mlp, 0:d]                # (MLP, D)
        bqkv = vv[0:1, :]                      # (1, 3D)
        bo = vv[1:2, 0:d]
        ln1_g = vv[2:3, 0:d]
        ln1_b = vv[3:4, 0:d]
        ln2_g = vv[4:5, 0:d]
        ln2_b = vv[5:6, 0:d]
        b1 = vv[6:7, 0:mlp]
        b2 = vv[7:8, 0:d]

        # ---- self-attention block (pre-norm), fused QKV matmul ----
        hn = layer_norm(h, ln1_g, ln1_b)
        qkv = jnp.dot(hn, wqkv, preferred_element_type=f32) + bqkv      # (R, 3D)
        ctx_heads = []
        for hh in range(num_heads):
            qh = qkv[:, hh * dh:(hh + 1) * dh]
            kh = qkv[:, d + hh * dh:d + (hh + 1) * dh]
            vh = qkv[:, 2 * d + hh * dh:2 * d + (hh + 1) * dh]
            sc = jnp.dot(qh, kh.T, preferred_element_type=f32) * scale + attn_bias
            # No max-subtraction: tiny D, 0.02-scale weights and finite NEG mask keep
            # exp well-conditioned; pad rows attend only to themselves (seg=batch).
            p = jnp.exp(sc)
            p = p * pl.reciprocal(jnp.sum(p, axis=-1, keepdims=True), approx=True)
            ctx_heads.append(jnp.dot(p, vh, preferred_element_type=f32))
        ctx = jnp.concatenate(ctx_heads, axis=-1)                       # (R, D)
        h = h + jnp.dot(ctx, wo, preferred_element_type=f32) + bo       # one proj matmul

        # ---- MLP block (pre-norm) ----
        hn = layer_norm(h, ln2_g, ln2_b)
        m = jnp.dot(hn, w1, preferred_element_type=f32) + b1
        # TODO(synk): HF ViT uses erf-based GELU; tanh approximation used here for
        # guaranteed Mosaic lowering (exp/tanh only).
        m = jax.nn.gelu(m, approximate=True)
        m = jnp.dot(m, w2, preferred_element_type=f32) + b2
        h = h + m

    # ---- CLS rows (static row reads), final LayerNorm, projection head ----
    cls = jnp.concatenate([h[b * seq:b * seq + 1, :] for b in range(batch)], axis=0)
    lnf_g = table_ref[cpp + r:cpp + r + 1, :]
    lnf_b = table_ref[cpp + r + 1:cpp + r + 2, :]
    cls = layer_norm(cls, lnf_g, lnf_b)
    # nn.Dropout(0.6) is identity in eval/inference mode.
    out = jnp.dot(cls, proj_ref[0:d, :], preferred_element_type=f32) + proj_ref[d:d + 1, :]
    out_ref[...] = out.astype(out_ref.dtype)                            # (B, 128) lane-dense


# ------------------------------- parameter creation -------------------------------
def init_params(key):
    # TODO(synk): ViTModel.from_pretrained loads a checkpoint; weights are
    # synthesized deterministically here instead.
    def nrm(k, shape, scale=0.02):
        return (scale * jax.random.normal(k, shape)).astype(jnp.float32)

    keys = iter(jax.random.split(key, 64))
    params = {
        "patch_w": nrm(next(keys), (CPP, D)),
        "patch_b": jnp.zeros((D,), jnp.float32),
        "cls_token": nrm(next(keys), (1, 1, D)),
        "pos_emb": nrm(next(keys), (1, S, D)),
        "ln_g": jnp.ones((D,), jnp.float32),
        "ln_b": jnp.zeros((D,), jnp.float32),
        "proj_w": nrm(next(keys), (D, EMB)),
        "proj_b": jnp.zeros((EMB,), jnp.float32),
        "layers": [],
    }
    for _ in range(LAYERS):
        params["layers"].append({
            "ln1_g": jnp.ones((D,), jnp.float32), "ln1_b": jnp.zeros((D,), jnp.float32),
            "wq": nrm(next(keys), (D, D)), "bq": jnp.zeros((D,), jnp.float32),
            "wk": nrm(next(keys), (D, D)), "bk": jnp.zeros((D,), jnp.float32),
            "wv": nrm(next(keys), (D, D)), "bv": jnp.zeros((D,), jnp.float32),
            "wo": nrm(next(keys), (D, D)), "bo": jnp.zeros((D,), jnp.float32),
            "ln2_g": jnp.ones((D,), jnp.float32), "ln2_b": jnp.zeros((D,), jnp.float32),
            "w1": nrm(next(keys), (D, MLP)), "b1": jnp.zeros((MLP,), jnp.float32),
            "w2": nrm(next(keys), (MLP, D)), "b2": jnp.zeros((D,), jnp.float32),
        })
    return params


def _pad_to(a, shape):
    return jnp.pad(a, [(0, t - s) for s, t in zip(a.shape, shape)])


def pack_params(params):
    """Repack all weights into 4 kernel-friendly slabs (done once, host side)."""
    lyrs = params["layers"]

    wmats, vecs = [], []
    for l in lyrs:
        wqkv = jnp.concatenate([l["wq"], l["wk"], l["wv"]], axis=1)        # (D, 3D)
        top = jnp.concatenate([wqkv, l["wo"], l["w1"]], axis=1)            # (D, WCOLS)
        bot = _pad_to(l["w2"], (MLP, WCOLS))                               # (MLP, WCOLS)
        wmats.append(jnp.concatenate([top, bot], axis=0))                  # (D+MLP, WCOLS)
        rows = [
            jnp.concatenate([l["bq"], l["bk"], l["bv"]]),                  # row 0: bqkv
            l["bo"], l["ln1_g"], l["ln1_b"],                               # rows 1..3
            l["ln2_g"], l["ln2_b"], l["b1"], l["b2"],                      # rows 4..7
        ]
        vecs.append(jnp.stack([_pad_to(v, (VCOLS,)) for v in rows]))       # (8, VCOLS)
    wmats = jnp.stack(wmats)                                               # (L, D+MLP, WCOLS)
    vecs = jnp.stack(vecs)                                                 # (L, 8, VCOLS)

    # Additive (S, D) embedding table:
    #   row 0      : cls_token + pos_emb[0]
    #   rows 1..NP : pos_emb[1:] + patch_bias
    emb_row = jnp.concatenate(
        [params["cls_token"][0] + params["pos_emb"][0, :1],
         params["pos_emb"][0, 1:] + params["patch_b"][None, :]], axis=0)   # (S, D)
    emb_pad = _pad_to(jnp.tile(emb_row, (B, 1)), (ROWS, D))                # (ROWS, D)

    table = jnp.concatenate(
        [params["patch_w"], emb_pad,
         params["ln_g"][None, :], params["ln_b"][None, :]], axis=0)        # (CPP+ROWS+2, D)

    proj = jnp.concatenate(
        [_pad_to(params["proj_w"], (D, OUT_LANES)),
         _pad_to(params["proj_b"][None, :], (1, OUT_LANES))], axis=0)      # (D+1, 128)

    return {"wmats": wmats, "vecs": vecs, "table": table, "proj": proj}


# ----------------------------------- forward pass ----------------------------------
def patchify(x):
    """(B, C, H, W) NCHW -> (B, NP, C*PATCH*PATCH), matching PyTorch conv flattening."""
    b, c, h, w = x.shape
    hp, wp = h // PATCH, w // PATCH
    x = x.reshape(b, c, hp, PATCH, wp, PATCH)
    x = jnp.transpose(x, (0, 2, 4, 1, 3, 5))       # (B, hp, wp, C, ph, pw)
    return x.reshape(b, hp * wp, c * PATCH * PATCH)


def dino_vit_embedding_forward(packed, x):
    b = x.shape[0]
    patches = patchify(x)                                                  # (B, NP, CPP)
    cpp = patches.shape[-1]
    # Zero "CLS placeholder" row per image + zero pad rows up to a sublane multiple.
    p_ext = jnp.concatenate(
        [jnp.zeros((b, 1, cpp), patches.dtype), patches], axis=1).reshape(b * S, cpp)
    patches_pad = jnp.pad(p_ext, ((0, ROWS - b * S), (0, 0)))              # (ROWS, CPP)

    kernel = functools.partial(_dino_vit_kernel, num_heads=NH, n_layers=LAYERS,
                               batch=b, seq=S, eps=LN_EPS)
    vmem = pl.BlockSpec(memory_space=pltpu.MemorySpace.VMEM)
    out = pl.pallas_call(
        kernel,
        out_shape=jax.ShapeDtypeStruct((b, OUT_LANES), jnp.float32),
        in_specs=[vmem] * 5,
        out_specs=vmem,
    )(patches_pad, packed["wmats"], packed["vecs"], packed["table"], packed["proj"])
    return out[:, :EMB]


# --------------------------------------- main ---------------------------------------
if __name__ == "__main__":
    key = jax.random.PRNGKey(0)
    pkey, xkey = jax.random.split(key)
    params = init_params(pkey)
    packed = pack_params(params)
    x = jax.random.normal(xkey, (B, C, IMG, IMG), dtype=jnp.float32)   # NCHW like PyTorch

    fwd = jax.jit(dino_vit_embedding_forward)
    out = jax.block_until_ready(fwd(packed, x))

    assert out.shape == (B, EMB), out.shape
    assert out.dtype == jnp.float32
    assert bool(jnp.all(jnp.isfinite(out)))
    print("KERNEL_OK")
</pallas_src>

<mosaic_0001>
module attributes {stable_mosaic.version = 11 : i64} {
  func.func @_dino_vit_kernel(%arg0: memref<16x192xf32, #tpu.memory_space<vmem>>, %arg1: memref<2x96x192xf32, #tpu.memory_space<vmem>>, %arg2: memref<2x8x96xf32, #tpu.memory_space<vmem>>, %arg3: memref<210x32xf32, #tpu.memory_space<vmem>>, %arg4: memref<33x128xf32, #tpu.memory_space<vmem>>, %arg5: memref<2x128xf32, #tpu.memory_space<vmem>>) attributes {dimension_semantics = [], scalar_prefetch = 0 : i64, scratch_operands = 0 : i64, tpu.core_type = #tpu.core_type<tc>} {
    %c0 = arith.constant 0 : index
    %c0_0 = arith.constant 0 : index
    %0 = vector.load %arg3[%c0, %c0_0] : memref<210x32xf32, #tpu.memory_space<vmem>>, vector<192x32xf32>
    %c192 = arith.constant 192 : index
    %c0_1 = arith.constant 0 : index
    %1 = vector.load %arg3[%c192, %c0_1] : memref<210x32xf32, #tpu.memory_space<vmem>>, vector<16x32xf32>
    %c0_2 = arith.constant 0 : index
    %c0_3 = arith.constant 0 : index
    %2 = vector.load %arg0[%c0_2, %c0_3] : memref<16x192xf32, #tpu.memory_space<vmem>>, vector<16x192xf32>
    %cst = arith.constant dense<0.000000e+00> : vector<16x32xf32>
    %3 = tpu.matmul %2, %0, %cst {dimension_numbers = #tpu.dot_dimension_numbers<[1], [0], [0], [1], [0, 0, 1, 1], [], []>} : vector<16x192xf32>, vector<192x32xf32>, vector<16x32xf32> -> vector<16x32xf32>
    %4 = arith.addf %3, %1 : vector<16x32xf32>
    %5 = tpu.iota {dimensions = array<i32: 0>} : vector<16x16xi32>
    %6 = tpu.iota {dimensions = array<i32: 1>} : vector<16x16xi32>
    %c2_i32 = arith.constant 2 : i32
    %7 = vector.broadcast %c2_i32 : i32 to vector<16x16xi32>
    %c10_i32 = arith.constant 10 : i32
    %8 = vector.broadcast %c10_i32 : i32 to vector<16x16xi32>
    %9 = arith.cmpi slt, %5, %8 : vector<16x16xi32>
    %c1_i32 = arith.constant 1 : i32
    %10 = vector.broadcast %c1_i32 : i32 to vector<16x16xi32>
    %11 = arith.select %9, %10, %7 : vector<16x16xi1>, vector<16x16xi32>
    %c5_i32 = arith.constant 5 : i32
    %12 = vector.broadcast %c5_i32 : i32 to vector<16x16xi32>
    %13 = arith.cmpi slt, %5, %12 : vector<16x16xi32>
    %c0_i32 = arith.constant 0 : i32
    %14 = vector.broadcast %c0_i32 : i32 to vector<16x16xi32>
    %15 = arith.select %13, %14, %11 : vector<16x16xi1>, vector<16x16xi32>
    %c2_i32_4 = arith.constant 2 : i32
    %16 = vector.broadcast %c2_i32_4 : i32 to vector<16x16xi32>
    %c10_i32_5 = arith.constant 10 : i32
    %17 = vector.broadcast %c10_i32_5 : i32 to vector<16x16xi32>
    %18 = arith.cmpi slt, %6, %17 : vector<16x16xi32>
    %c1_i32_6 = arith.constant 1 : i32
    %19 = vector.broadcast %c1_i32_6 : i32 to vector<16x16xi32>
    %20 = arith.select %18, %19, %16 : vector<16x16xi1>, vector<16x16xi32>
    %c5_i32_7 = arith.constant 5 : i32
    %21 = vector.broadcast %c5_i32_7 : i32 to vector<16x16xi32>
    %22 = arith.cmpi slt, %6, %21 : vector<16x16xi32>
    %c0_i32_8 = arith.constant 0 : i32
    %23 = vector.broadcast %c0_i32_8 : i32 to vector<16x16xi32>
    %24 = arith.select %22, %23, %20 : vector<16x16xi1>, vector<16x16xi32>
    %25 = arith.cmpi eq, %15, %24 : vector<16x16xi32>
    %cst_9 = arith.constant 0.000000e+00 : f32
    %cst_10 = arith.constant -1.000000e+04 : f32
    %26 = vector.broadcast %cst_9 : f32 to vector<16x16xf32>
    %27 = vector.broadcast %cst_10 : f32 to vector<16x16xf32>
    %28 = arith.select %25, %26, %27 : vector<16x16xi1>, vector<16x16xf32>
    %c0_11 = arith.constant 0 : index
    %c0_12 = arith.constant 0 : index
    %c0_13 = arith.constant 0 : index
    %29 = vector.load %arg1[%c0_11, %c0_12, %c0_13] : memref<2x96x192xf32, #tpu.memory_space<vmem>>, vector<1x96x192xf32>
    %30 = vector.shape_cast %29 : vector<1x96x192xf32> to vector<96x192xf32>
    %c0_14 = arith.constant 0 : index
    %c0_15 = arith.constant 0 : index
    %c0_16 = arith.constant 0 : index
    %31 = vector.load %arg2[%c0_14, %c0_15, %c0_16] : memref<2x8x96xf32, #tpu.memory_space<vmem>>, vector<1x8x96xf32>
    %32 = vector.shape_cast %31 : vector<1x8x96xf32> to vector<8x96xf32>
    %33 = vector.extract_strided_slice %30 {offsets = [0, 0], sizes = [32, 96], strides = [1, 1]} : vector<96x192xf32> to vector<32x96xf32>
    %34 = vector.extract_strided_slice %30 {offsets = [0, 96], sizes = [32, 32], strides = [1, 1]} : vector<96x192xf32> to vector<32x32xf32>
    %35 = vector.extract_strided_slice %30 {offsets = [0, 128], sizes = [32, 64], strides = [1, 1]} : vector<96x192xf32> to vector<32x64xf32>
    %36 = vector.extract_strided_slice %30 {offsets = [32, 0], sizes = [64, 32], strides = [1, 1]} : vector<96x192xf32> to vector<64x32xf32>
    %37 = vector.extract_strided_slice %32 {offsets = [0, 0], sizes = [1, 96], strides = [1, 1]} : vector<8x96xf32> to vector<1x96xf32>
    %38 = vector.extract_strided_slice %32 {offsets = [1, 0], sizes = [1, 32], strides = [1, 1]} : vector<8x96xf32> to vector<1x32xf32>
    %39 = vector.extract_strided_slice %32 {offsets = [2, 0], sizes = [1, 32], strides = [1, 1]} : vector<8x96xf32> to vector<1x32xf32>
    %40 = vector.extract_strided_slice %32 {offsets = [3, 0], sizes = [1, 32], strides = [1, 1]} : vector<8x96xf32> to vector<1x32xf32>
    %41 = vector.extract_strided_slice %32 {offsets = [4, 0], sizes = [1, 32], strides = [1, 1]} : vector<8x96xf32> to vector<1x32xf32>
    %42 = vector.extract_strided_slice %32 {offsets = [5, 0], sizes = [1, 32], strides = [1, 1]} : vector<8x96xf32> to vector<1x32xf32>
    %43 = vector.extract_strided_slice %32 {offsets = [6, 0], sizes = [1, 64], strides = [1, 1]} : vector<8x96xf32> to vector<1x64xf32>
    %44 = vector.extract_strided_slice %32 {offsets = [7, 0], sizes = [1, 32], strides = [1, 1]} : vector<8x96xf32> to vector<1x32xf32>
    %cst_17 = arith.constant dense<0.000000e+00> : vector<16xf32>
    %45 = vector.multi_reduction <add>, %4, %cst_17 [1] : vector<16x32xf32> to vector<16xf32>
    %46 = vector.shape_cast %45 : vector<16xf32> to vector<16x1xf32>
    %cst_18 = arith.constant 3.200000e+01 : f32
    %47 = vector.broadcast %cst_18 : f32 to vector<16x1xf32>
    %48 = arith.divf %46, %47 : vector<16x1xf32>
    %49 = vector.broadcast %48 : vector<16x1xf32> to vector<16x32xf32>
    %50 = arith.subf %4, %49 : vector<16x32xf32>
    %51 = arith.mulf %50, %50 : vector<16x32xf32>
    %cst_19 = arith.constant dense<0.000000e+00> : vector<16xf32>
    %52 = vector.multi_reduction <add>, %51, %cst_19 [1] : vector<16x32xf32> to vector<16xf32>
    %53 = vector.shape_cast %52 : vector<16xf32> to vector<16x1xf32>
    %cst_20 = arith.constant 3.200000e+01 : f32
    %54 = vector.broadcast %cst_20 : f32 to vector<16x1xf32>
    %55 = arith.divf %53, %54 : vector<16x1xf32>
    %56 = vector.broadcast %48 : vector<16x1xf32> to vector<16x32xf32>
    %57 = arith.subf %4, %56 : vector<16x32xf32>
    %cst_21 = arith.constant 9.99999996E-13 : f32
    %58 = vector.broadcast %cst_21 : f32 to vector<16x1xf32>
    %59 = arith.addf %55, %58 : vector<16x1xf32>
    %60 = math.rsqrt %59 : vector<16x1xf32>
    %61 = vector.broadcast %60 : vector<16x1xf32> to vector<16x32xf32>
    %62 = arith.mulf %57, %61 : vector<16x32xf32>
    %63 = vector.broadcast %39 : vector<1x32xf32> to vector<16x32xf32>
    %64 = arith.mulf %62, %63 : vector<16x32xf32>
    %65 = vector.broadcast %40 : vector<1x32xf32> to vector<16x32xf32>
    %66 = arith.addf %64, %65 : vector<16x32xf32>
    %cst_22 = arith.constant dense<0.000000e+00> : vector<16x96xf32>
    %67 = tpu.matmul %66, %33, %cst_22 {dimension_numbers = #tpu.dot_dimension_numbers<[1], [0], [0], [1], [0, 0, 1, 1], [], []>} : vector<16x32xf32>, vector<32x96xf32>, vector<16x96xf32> -> vector<16x96xf32>
    %68 = vector.broadcast %37 : vector<1x96xf32> to vector<16x96xf32>
    %69 = arith.addf %67, %68 : vector<16x96xf32>
    %70 = vector.extract_strided_slice %69 {offsets = [0, 0], sizes = [16, 8], strides = [1, 1]} : vector<16x96xf32> to vector<16x8xf32>
    %71 = vector.extract_strided_slice %69 {offsets = [0, 32], sizes = [16, 8], strides = [1, 1]} : vector<16x96xf32> to vector<16x8xf32>
    %72 = vector.extract_strided_slice %69 {offsets = [0, 64], sizes = [16, 8], strides = [1, 1]} : vector<16x96xf32> to vector<16x8xf32>
    %73 = tpu.transpose %71, [1, 0] : vector<16x8xf32> -> vector<8x16xf32>
    %cst_23 = arith.constant dense<0.000000e+00> : vector<16x16xf32>
    %74 = tpu.matmul %70, %73, %cst_23 {dimension_numbers = #tpu.dot_dimension_numbers<[1], [0], [0], [1], [0, 0, 1, 1], [], []>} : vector<16x8xf32>, vector<8x16xf32>, vector<16x16xf32> -> vector<16x16xf32>
    %cst_24 = arith.constant 0.353553385 : f32
    %75 = vector.broadcast %cst_24 : f32 to vector<16x16xf32>
    %76 = arith.mulf %74, %75 : vector<16x16xf32>
    %77 = arith.addf %76, %28 : vector<16x16xf32>
    %78 = math.exp %77 : vector<16x16xf32>
    %cst_25 = arith.constant dense<0.000000e+00> : vector<16xf32>
    %79 = vector.multi_reduction <add>, %78, %cst_25 [1] : vector<16x16xf32> to vector<16xf32>
    %80 = vector.shape_cast %79 : vector<16xf32> to vector<16x1xf32>
    %81 = tpu.reciprocal %80 {approx = true} : vector<16x1xf32> -> vector<16x1xf32>
    %82 = vector.broadcast %81 : vector<16x1xf32> to vector<16x16xf32>
    %83 = arith.mulf %78, %82 : vector<16x16xf32>
    %cst_26 = arith.constant dense<0.000000e+00> : vector<16x8xf32>
    %84 = tpu.matmul %83, %72, %cst_26 {dimension_numbers = #tpu.dot_dimension_numbers<[1], [0], [0], [1], [0, 0, 1, 1], [], []>} : vector<16x16xf32>, vector<16x8xf32>, vector<16x8xf32> -> vector<16x8xf32>
    %85 = vector.extract_strided_slice %69 {offsets = [0, 8], sizes = [16, 8], strides = [1, 1]} : vector<16x96xf32> to vector<16x8xf32>
    %86 = vector.extract_strided_slice %69 {offsets = [0, 40], sizes = [16, 8], strides = [1, 1]} : vector<16x96xf32> to vector<16x8xf32>
    %87 = vector.extract_strided_slice %69 {offsets = [0, 72], sizes = [16, 8], strides = [1, 1]} : vector<16x96xf32> to vector<16x8xf32>
    %88 = tpu.transpose %86, [1, 0] : vector<16x8xf32> -> vector<8x16xf32>
    %cst_27 = arith.constant dense<0.000000e+00> : vector<16x16xf32>
    %89 = tpu.matmul %85, %88, %cst_27 {dimension_numbers = #tpu.dot_dimension_numbers<[1], [0], [0], [1], [0, 0, 1, 1], [], []>} : vector<16x8xf32>, vector<8x16xf32>, vector<16x16xf32> -> vector<16x16xf32>
    %cst_28 = arith.constant 0.353553385 : f32
    %90 = vector.broadcast %cst_28 : f32 to vector<16x16xf32>
    %91 = arith.mulf %89, %90 : vector<16x16xf32>
    %92 = arith.addf %91, %28 : vector<16x16xf32>
    %93 = math.exp %92 : vector<16x16xf32>
    %cst_29 = arith.constant dense<0.000000e+00> : vector<16xf32>
    %94 = vector.multi_reduction <add>, %93, %cst_29 [1] : vector<16x16xf32> to vector<16xf32>
    %95 = vector.shape_cast %94 : vector<16xf32> to vector<16x1xf32>
    %96 = tpu.reciprocal %95 {approx = true} : vector<16x1xf32> -> vector<16x1xf32>
    %97 = vector.broadcast %96 : vector<16x1xf32> to vector<16x16xf32>
    %98 = arith.mulf %93, %97 : vector<16x16xf32>
    %cst_30 = arith.constant dense<0.000000e+00> : vector<16x8xf32>
    %99 = tpu.matmul %98, %87, %cst_30 {dimension_numbers = #tpu.dot_dimension_numbers<[1], [0], [0], [1], [0, 0, 1, 1], [], []>} : vector<16x16xf32>, vector<16x8xf32>, vector<16x8xf32> -> vector<16x8xf32>
    %100 = vector.extract_strided_slice %69 {offsets = [0, 16], sizes = [16, 8], strides = [1, 1]} : vector<16x96xf32> to vector<16x8xf32>
    %101 = vector.extract_strided_slice %69 {offsets = [0, 48], sizes = [16, 8], strides = [1, 1]} : vector<16x96xf32> to vector<16x8xf32>
    %102 = vector.extract_strided_slice %69 {offsets = [0, 80], sizes = [16, 8], strides = [1, 1]} : vector<16x96xf32> to vector<16x8xf32>
    %103 = tpu.transpose %101, [1, 0] : vector<16x8xf32> -> vector<8x16xf32>
    %cst_31 = arith.constant dense<0.000000e+00> : vector<16x16xf32>
    %104 = tpu.matmul %100, %103, %cst_31 {dimension_numbers = #tpu.dot_dimension_numbers<[1], [0], [0], [1], [0, 0, 1, 1], [], []>} : vector<16x8xf32>, vector<8x16xf32>, vector<16x16xf32> -> vector<16x16xf32>
    %cst_32 = arith.constant 0.353553385 : f32
    %105 = vector.broadcast %cst_32 : f32 to vector<16x16xf32>
    %106 = arith.mulf %104, %105 : vector<16x16xf32>
    %107 = arith.addf %106, %28 : vector<16x16xf32>
    %108 = math.exp %107 : vector<16x16xf32>
    %cst_33 = arith.constant dense<0.000000e+00> : vector<16xf32>
    %109 = vector.multi_reduction <add>, %108, %cst_33 [1] : vector<16x16xf32> to vector<16xf32>
    %110 = vector.shape_cast %109 : vector<16xf32> to vector<16x1xf32>
    %111 = tpu.reciprocal %110 {approx = true} : vector<16x1xf32> -> vector<16x1xf32>
    %112 = vector.broadcast %111 : vector<16x1xf32> to vector<16x16xf32>
    %113 = arith.mulf %108, %112 : vector<16x16xf32>
    %cst_34 = arith.constant dense<0.000000e+00> : vector<16x8xf32>
    %114 = tpu.matmul %113, %102, %cst_34 {dimension_numbers = #tpu.dot_dimension_numbers<[1], [0], [0], [1], [0, 0, 1, 1], [], []>} : vector<16x16xf32>, vector<16x8xf32>, vector<16x8xf32> -> vector<16x8xf32>
    %115 = vector.extract_strided_slice %69 {offsets = [0, 24], sizes = [16, 8], strides = [1, 1]} : vector<16x96xf32> to vector<16x8xf32>
    %116 = vector.extract_strided_slice %69 {offsets = [0, 56], sizes = [16, 8], strides = [1, 1]} : vector<16x96xf32> to vector<16x8xf32>
    %117 = vector.extract_strided_slice %69 {offsets = [0, 88], sizes = [16, 8], strides = [1, 1]} : vector<16x96xf32> to vector<16x8xf32>
    %118 = tpu.transpose %116, [1, 0] : vector<16x8xf32> -> vector<8x16xf32>
    %cst_35 = arith.constant dense<0.000000e+00> : vector<16x16xf32>
    %119 = tpu.matmul %115, %118, %cst_35 {dimension_numbers = #tpu.dot_dimension_numbers<[1], [0], [0], [1], [0, 0, 1, 1], [], []>} : vector<16x8xf32>, vector<8x16xf32>, vector<16x16xf32> -> vector<16x16xf32>
    %cst_36 = arith.constant 0.353553385 : f32
    %120 = vector.broadcast %cst_36 : f32 to vector<16x16xf32>
    %121 = arith.mulf %119, %120 : vector<16x16xf32>
    %122 = arith.addf %121, %28 : vector<16x16xf32>
    %123 = math.exp %122 : vector<16x16xf32>
    %cst_37 = arith.constant dense<0.000000e+00> : vector<16xf32>
    %124 = vector.multi_reduction <add>, %123, %cst_37 [1] : vector<16x16xf32> to vector<16xf32>
    %125 = vector.shape_cast %124 : vector<16xf32> to vector<16x1xf32>
    %126 = tpu.reciprocal %125 {approx = true} : vector<16x1xf32> -> vector<16x1xf32>
    %127 = vector.broadcast %126 : vector<16x1xf32> to vector<16x16xf32>
    %128 = arith.mulf %123, %127 : vector<16x16xf32>
    %cst_38 = arith.constant dense<0.000000e+00> : vector<16x8xf32>
    %129 = tpu.matmul %128, %117, %cst_38 {dimension_numbers = #tpu.dot_dimension_numbers<[1], [0], [0], [1], [0, 0, 1, 1], [], []>} : vector<16x16xf32>, vector<16x8xf32>, vector<16x8xf32> -> vector<16x8xf32>
    %130 = tpu.concatenate %84, %99, %114, %129 in 1 : vector<16x8xf32>, vector<16x8xf32>, vector<16x8xf32>, vector<16x8xf32> -> vector<16x32xf32>
    %cst_39 = arith.constant dense<0.000000e+00> : vector<16x32xf32>
    %131 = tpu.matmul %130, %34, %cst_39 {dimension_numbers = #tpu.dot_dimension_numbers<[1], [0], [0], [1], [0, 0, 1, 1], [], []>} : vector<16x32xf32>, vector<32x32xf32>, vector<16x32xf32> -> vector<16x32xf32>
    %132 = arith.addf %4, %131 : vector<16x32xf32>
    %133 = vector.broadcast %38 : vector<1x32xf32> to vector<16x32xf32>
    %134 = arith.addf %132, %133 : vector<16x32xf32>
    %cst_40 = arith.constant dense<0.000000e+00> : vector<16xf32>
    %135 = vector.multi_reduction <add>, %134, %cst_40 [1] : vector<16x32xf32> to vector<16xf32>
    %136 = vector.shape_cast %135 : vector<16xf32> to vector<16x1xf32>
    %cst_41 = arith.constant 3.200000e+01 : f32
    %137 = vector.broadcast %cst_41 : f32 to vector<16x1xf32>
    %138 = arith.divf %136, %137 : vector<16x1xf32>
    %139 = vector.broadcast %138 : vector<16x1xf32> to vector<16x32xf32>
    %140 = arith.subf %134, %139 : vector<16x32xf32>
    %141 = arith.mulf %140, %140 : vector<16x32xf32>
    %cst_42 = arith.constant dense<0.000000e+00> : vector<16xf32>
    %142 = vector.multi_reduction <add>, %141, %cst_42 [1] : vector<16x32xf32> to vector<16xf32>
    %143 = vector.shape_cast %142 : vector<16xf32> to vector<16x1xf32>
    %cst_43 = arith.constant 3.200000e+01 : f32
    %144 = vector.broadcast %cst_43 : f32 to vector<16x1xf32>
    %145 = arith.divf %143, %144 : vector<16x1xf32>
    %146 = vector.broadcast %138 : vector<16x1xf32> to vector<16x32xf32>
    %147 = arith.subf %134, %146 : vector<16x32xf32>
    %cst_44 = arith.constant 9.99999996E-13 : f32
    %148 = vector.broadcast %cst_44 : f32 to vector<16x1xf32>
    %149 = arith.addf %145, %148 : vector<16x1xf32>
    %150 = math.rsqrt %149 : vector<16x1xf32>
    %151 = vector.broadcast %150 : vector<16x1xf32> to vector<16x32xf32>
    %152 = arith.mulf %147, %151 : vector<16x32xf32>
    %153 = vector.broadcast %41 : vector<1x32xf32> to vector<16x32xf32>
    %154 = arith.mulf %152, %153 : vector<16x32xf32>
    %155 = vector.broadcast %42 : vector<1x32xf32> to vector<16x32xf32>
    %156 = arith.addf %154, %155 : vector<16x32xf32>
    %cst_45 = arith.constant dense<0.000000e+00> : vector<16x64xf32>
    %157 = tpu.matmul %156, %35, %cst_45 {dimension_numbers = #tpu.dot_dimension_numbers<[1], [0], [0], [1], [0, 0, 1, 1], [], []>} : vector<16x32xf32>, vector<32x64xf32>, vector<16x64xf32> -> vector<16x64xf32>
    %158 = vector.broadcast %43 : vector<1x64xf32> to vector<16x64xf32>
    %159 = arith.addf %157, %158 : vector<16x64xf32>
    %160 = arith.mulf %159, %159 : vector<16x64xf32>
    %161 = arith.mulf %159, %160 : vector<16x64xf32>
    %cst_46 = arith.constant 4.471500e-02 : f32
    %162 = vector.broadcast %cst_46 : f32 to vector<16x64xf32>
    %163 = arith.mulf %162, %161 : vector<16x64xf32>
    %164 = arith.addf %159, %163 : vector<16x64xf32>
    %cst_47 = arith.constant 0.797884583 : f32
    %165 = vector.broadcast %cst_47 : f32 to vector<16x64xf32>
    %166 = arith.mulf %165, %164 : vector<16x64xf32>
    %167 = math.tanh %166 : vector<16x64xf32>
    %cst_48 = arith.constant 1.000000e+00 : f32
    %168 = vector.broadcast %cst_48 : f32 to vector<16x64xf32>
    %169 = arith.addf %168, %167 : vector<16x64xf32>
    %cst_49 = arith.constant 5.000000e-01 : f32
    %170 = vector.broadcast %cst_49 : f32 to vector<16x64xf32>
    %171 = arith.mulf %170, %169 : vector<16x64xf32>
    %172 = arith.mulf %159, %171 : vector<16x64xf32>
    %cst_50 = arith.constant dense<0.000000e+00> : vector<16x32xf32>
    %173 = tpu.matmul %172, %36, %cst_50 {dimension_numbers = #tpu.dot_dimension_numbers<[1], [0], [0], [1], [0, 0, 1, 1], [], []>} : vector<16x64xf32>, vector<64x32xf32>, vector<16x32xf32> -> vector<16x32xf32>
    %174 = vector.broadcast %44 : vector<1x32xf32> to vector<16x32xf32>
    %175 = arith.addf %173, %174 : vector<16x32xf32>
    %176 = arith.addf %134, %175 : vector<16x32xf32>
    %c1 = arith.constant 1 : index
    %c0_51 = arith.constant 0 : index
    %c0_52 = arith.constant 0 : index
    %177 = vector.load %arg1[%c1, %c0_51, %c0_52] : memref<2x96x192xf32, #tpu.memory_space<vmem>>, vector<1x96x192xf32>
    %178 = vector.shape_cast %177 : vector<1x96x192xf32> to vector<96x192xf32>
    %c1_53 = arith.constant 1 : index
    %c0_54 = arith.constant 0 : index
    %c0_55 = arith.constant 0 : index
    %179 = vector.load %arg2[%c1_53, %c0_54, %c0_55] : memref<2x8x96xf32, #tpu.memory_space<vmem>>, vector<1x8x96xf32>
    %180 = vector.shape_cast %179 : vector<1x8x96xf32> to vector<8x96xf32>
    %181 = vector.extract_strided_slice %178 {offsets = [0, 0], sizes = [32, 96], strides = [1, 1]} : vector<96x192xf32> to vector<32x96xf32>
    %182 = vector.extract_strided_slice %178 {offsets = [0, 96], sizes = [32, 32], strides = [1, 1]} : vector<96x192xf32> to vector<32x32xf32>
    %183 = vector.extract_strided_slice %178 {offsets = [0, 128], sizes = [32, 64], strides = [1, 1]} : vector<96x192xf32> to vector<32x64xf32>
    %184 = vector.extract_strided_slice %178 {offsets = [32, 0], sizes = [64, 32], strides = [1, 1]} : vector<96x192xf32> to vector<64x32xf32>
    %185 = vector.extract_strided_slice %180 {offsets = [0, 0], sizes = [1, 96], strides = [1, 1]} : vector<8x96xf32> to vector<1x96xf32>
    %186 = vector.extract_strided_slice %180 {offsets = [1, 0], sizes = [1, 32], strides = [1, 1]} : vector<8x96xf32> to vector<1x32xf32>
    %187 = vector.extract_strided_slice %180 {offsets = [2, 0], sizes = [1, 32], strides = [1, 1]} : vector<8x96xf32> to vector<1x32xf32>
    %188 = vector.extract_strided_slice %180 {offsets = [3, 0], sizes = [1, 32], strides = [1, 1]} : vector<8x96xf32> to vector<1x32xf32>
    %189 = vector.extract_strided_slice %180 {offsets = [4, 0], sizes = [1, 32], strides = [1, 1]} : vector<8x96xf32> to vector<1x32xf32>
    %190 = vector.extract_strided_slice %180 {offsets = [5, 0], sizes = [1, 32], strides = [1, 1]} : vector<8x96xf32> to vector<1x32xf32>
    %191 = vector.extract_strided_slice %180 {offsets = [6, 0], sizes = [1, 64], strides = [1, 1]} : vector<8x96xf32> to vector<1x64xf32>
    %192 = vector.extract_strided_slice %180 {offsets = [7, 0], sizes = [1, 32], strides = [1, 1]} : vector<8x96xf32> to vector<1x32xf32>
    %cst_56 = arith.constant dense<0.000000e+00> : vector<16xf32>
    %193 = vector.multi_reduction <add>, %176, %cst_56 [1] : vector<16x32xf32> to vector<16xf32>
    %194 = vector.shape_cast %193 : vector<16xf32> to vector<16x1xf32>
    %cst_57 = arith.constant 3.200000e+01 : f32
    %195 = vector.broadcast %cst_57 : f32 to vector<16x1xf32>
    %196 = arith.divf %194, %195 : vector<16x1xf32>
    %197 = vector.broadcast %196 : vector<16x1xf32> to vector<16x32xf32>
    %198 = arith.subf %176, %197 : vector<16x32xf32>
    %199 = arith.mulf %198, %198 : vector<16x32xf32>
    %cst_58 = arith.constant dense<0.000000e+00> : vector<16xf32>
    %200 = vector.multi_reduction <add>, %199, %cst_58 [1] : vector<16x32xf32> to vector<16xf32>
    %201 = vector.shape_cast %200 : vector<16xf32> to vector<16x1xf32>
    %cst_59 = arith.constant 3.200000e+01 : f32
    %202 = vector.broadcast %cst_59 : f32 to vector<16x1xf32>
    %203 = arith.divf %201, %202 : vector<16x1xf32>
    %204 = vector.broadcast %196 : vector<16x1xf32> to vector<16x32xf32>
    %205 = arith.subf %176, %204 : vector<16x32xf32>
    %cst_60 = arith.constant 9.99999996E-13 : f32
    %206 = vector.broadcast %cst_60 : f32 to vector<16x1xf32>
    %207 = arith.addf %203, %206 : vector<16x1xf32>
    %208 = math.rsqrt %207 : vector<16x1xf32>
    %209 = vector.broadcast %208 : vector<16x1xf32> to vector<16x32xf32>
    %210 = arith.mulf %205, %209 : vector<16x32xf32>
    %211 = vector.broadcast %187 : vector<1x32xf32> to vector<16x32xf32>
    %212 = arith.mulf %210, %211 : vector<16x32xf32>
    %213 = vector.broadcast %188 : vector<1x32xf32> to vector<16x32xf32>
    %214 = arith.addf %212, %213 : vector<16x32xf32>
    %cst_61 = arith.constant dense<0.000000e+00> : vector<16x96xf32>
    %215 = tpu.matmul %214, %181, %cst_61 {dimension_numbers = #tpu.dot_dimension_numbers<[1], [0], [0], [1], [0, 0, 1, 1], [], []>} : vector<16x32xf32>, vector<32x96xf32>, vector<16x96xf32> -> vector<16x96xf32>
    %216 = vector.broadcast %185 : vector<1x96xf32> to vector<16x96xf32>
    %217 = arith.addf %215, %216 : vector<16x96xf32>
    %218 = vector.extract_strided_slice %217 {offsets = [0, 0], sizes = [16, 8], strides = [1, 1]} : vector<16x96xf32> to vector<16x8xf32>
    %219 = vector.extract_strided_slice %217 {offsets = [0, 32], sizes = [16, 8], strides = [1, 1]} : vector<16x96xf32> to vector<16x8xf32>
    %220 = vector.extract_strided_slice %217 {offsets = [0, 64], sizes = [16, 8], strides = [1, 1]} : vector<16x96xf32> to vector<16x8xf32>
    %221 = tpu.transpose %219, [1, 0] : vector<16x8xf32> -> vector<8x16xf32>
    %cst_62 = arith.constant dense<0.000000e+00> : vector<16x16xf32>
    %222 = tpu.matmul %218, %221, %cst_62 {dimension_numbers = #tpu.dot_dimension_numbers<[1], [0], [0], [1], [0, 0, 1, 1], [], []>} : vector<16x8xf32>, vector<8x16xf32>, vector<16x16xf32> -> vector<16x16xf32>
    %cst_63 = arith.constant 0.353553385 : f32
    %223 = vector.broadcast %cst_63 : f32 to vector<16x16xf32>
    %224 = arith.mulf %222, %223 : vector<16x16xf32>
    %225 = arith.addf %224, %28 : vector<16x16xf32>
    %226 = math.exp %225 : vector<16x16xf32>
    %cst_64 = arith.constant dense<0.000000e+00> : vector<16xf32>
    %227 = vector.multi_reduction <add>, %226, %cst_64 [1] : vector<16x16xf32> to vector<16xf32>
    %228 = vector.shape_cast %227 : vector<16xf32> to vector<16x1xf32>
    %229 = tpu.reciprocal %228 {approx = true} : vector<16x1xf32> -> vector<16x1xf32>
    %230 = vector.broadcast %229 : vector<16x1xf32> to vector<16x16xf32>
    %231 = arith.mulf %226, %230 : vector<16x16xf32>
    %cst_65 = arith.constant dense<0.000000e+00> : vector<16x8xf32>
    %232 = tpu.matmul %231, %220, %cst_65 {dimension_numbers = #tpu.dot_dimension_numbers<[1], [0], [0], [1], [0, 0, 1, 1], [], []>} : vector<16x16xf32>, vector<16x8xf32>, vector<16x8xf32> -> vector<16x8xf32>
    %233 = vector.extract_strided_slice %217 {offsets = [0, 8], sizes = [16, 8], strides = [1, 1]} : vector<16x96xf32> to vector<16x8xf32>
    %234 = vector.extract_strided_slice %217 {offsets = [0, 40], sizes = [16, 8], strides = [1, 1]} : vector<16x96xf32> to vector<16x8xf32>
    %235 = vector.extract_strided_slice %217 {offsets = [0, 72], sizes = [16, 8], strides = [1, 1]} : vector<16x96xf32> to vector<16x8xf32>
    %236 = tpu.transpose %234, [1, 0] : vector<16x8xf32> -> vector<8x16xf32>
    %cst_66 = arith.constant dense<0.000000e+00> : vector<16x16xf32>
    %237 = tpu.matmul %233, %236, %cst_66 {dimension_numbers = #tpu.dot_dimension_numbers<[1], [0], [0], [1], [0, 0, 1, 1], [], []>} : vector<16x8xf32>, vector<8x16xf32>, vector<16x16xf32> -> vector<16x16xf32>
    %cst_67 = arith.constant 0.353553385 : f32
    %238 = vector.broadcast %cst_67 : f32 to vector<16x16xf32>
    %239 = arith.mulf %237, %238 : vector<16x16xf32>
    %240 = arith.addf %239, %28 : vector<16x16xf32>
    %241 = math.exp %240 : vector<16x16xf32>
    %cst_68 = arith.constant dense<0.000000e+00> : vector<16xf32>
    %242 = vector.multi_reduction <add>, %241, %cst_68 [1] : vector<16x16xf32> to vector<16xf32>
    %243 = vector.shape_cast %242 : vector<16xf32> to vector<16x1xf32>
    %244 = tpu.reciprocal %243 {approx = true} : vector<16x1xf32> -> vector<16x1xf32>
    %245 = vector.broadcast %244 : vector<16x1xf32> to vector<16x16xf32>
    %246 = arith.mulf %241, %245 : vector<16x16xf32>
    %cst_69 = arith.constant dense<0.000000e+00> : vector<16x8xf32>
    %247 = tpu.matmul %246, %235, %cst_69 {dimension_numbers = #tpu.dot_dimension_numbers<[1], [0], [0], [1], [0, 0, 1, 1], [], []>} : vector<16x16xf32>, vector<16x8xf32>, vector<16x8xf32> -> vector<16x8xf32>
    %248 = vector.extract_strided_slice %217 {offsets = [0, 16], sizes = [16, 8], strides = [1, 1]} : vector<16x96xf32> to vector<16x8xf32>
    %249 = vector.extract_strided_slice %217 {offsets = [0, 48], sizes = [16, 8], strides = [1, 1]} : vector<16x96xf32> to vector<16x8xf32>
    %250 = vector.extract_strided_slice %217 {offsets = [0, 80], sizes = [16, 8], strides = [1, 1]} : vector<16x96xf32> to vector<16x8xf32>
    %251 = tpu.transpose %249, [1, 0] : vector<16x8xf32> -> vector<8x16xf32>
    %cst_70 = arith.constant dense<0.000000e+00> : vector<16x16xf32>
    %252 = tpu.matmul %248, %251, %cst_70 {dimension_numbers = #tpu.dot_dimension_numbers<[1], [0], [0], [1], [0, 0, 1, 1], [], []>} : vector<16x8xf32>, vector<8x16xf32>, vector<16x16xf32> -> vector<16x16xf32>
    %cst_71 = arith.constant 0.353553385 : f32
    %253 = vector.broadcast %cst_71 : f32 to vector<16x16xf32>
    %254 = arith.mulf %252, %253 : vector<16x16xf32>
    %255 = arith.addf %254, %28 : vector<16x16xf32>
    %256 = math.exp %255 : vector<16x16xf32>
    %cst_72 = arith.constant dense<0.000000e+00> : vector<16xf32>
    %257 = vector.multi_reduction <add>, %256, %cst_72 [1] : vector<16x16xf32> to vector<16xf32>
    %258 = vector.shape_cast %257 : vector<16xf32> to vector<16x1xf32>
    %259 = tpu.reciprocal %258 {approx = true} : vector<16x1xf32> -> vector<16x1xf32>
    %260 = vector.broadcast %259 : vector<16x1xf32> to vector<16x16xf32>
    %261 = arith.mulf %256, %260 : vector<16x16xf32>
    %cst_73 = arith.constant dense<0.000000e+00> : vector<16x8xf32>
    %262 = tpu.matmul %261, %250, %cst_73 {dimension_numbers = #tpu.dot_dimension_numbers<[1], [0], [0], [1], [0, 0, 1, 1], [], []>} : vector<16x16xf32>, vector<16x8xf32>, vector<16x8xf32> -> vector<16x8xf32>
    %263 = vector.extract_strided_slice %217 {offsets = [0, 24], sizes = [16, 8], strides = [1, 1]} : vector<16x96xf32> to vector<16x8xf32>
    %264 = vector.extract_strided_slice %217 {offsets = [0, 56], sizes = [16, 8], strides = [1, 1]} : vector<16x96xf32> to vector<16x8xf32>
    %265 = vector.extract_strided_slice %217 {offsets = [0, 88], sizes = [16, 8], strides = [1, 1]} : vector<16x96xf32> to vector<16x8xf32>
    %266 = tpu.transpose %264, [1, 0] : vector<16x8xf32> -> vector<8x16xf32>
    %cst_74 = arith.constant dense<0.000000e+00> : vector<16x16xf32>
    %267 = tpu.matmul %263, %266, %cst_74 {dimension_numbers = #tpu.dot_dimension_numbers<[1], [0], [0], [1], [0, 0, 1, 1], [], []>} : vector<16x8xf32>, vector<8x16xf32>, vector<16x16xf32> -> vector<16x16xf32>
    %cst_75 = arith.constant 0.353553385 : f32
    %268 = vector.broadcast %cst_75 : f32 to vector<16x16xf32>
    %269 = arith.mulf %267, %268 : vector<16x16xf32>
    %270 = arith.addf %269, %28 : vector<16x16xf32>
    %271 = math.exp %270 : vector<16x16xf32>
    %cst_76 = arith.constant dense<0.000000e+00> : vector<16xf32>
    %272 = vector.multi_reduction <add>, %271, %cst_76 [1] : vector<16x16xf32> to vector<16xf32>
    %273 = vector.shape_cast %272 : vector<16xf32> to vector<16x1xf32>
    %274 = tpu.reciprocal %273 {approx = true} : vector<16x1xf32> -> vector<16x1xf32>
    %275 = vector.broadcast %274 : vector<16x1xf32> to vector<16x16xf32>
    %276 = arith.mulf %271, %275 : vector<16x16xf32>
    %cst_77 = arith.constant dense<0.000000e+00> : vector<16x8xf32>
    %277 = tpu.matmul %276, %265, %cst_77 {dimension_numbers = #tpu.dot_dimension_numbers<[1], [0], [0], [1], [0, 0, 1, 1], [], []>} : vector<16x16xf32>, vector<16x8xf32>, vector<16x8xf32> -> vector<16x8xf32>
    %278 = tpu.concatenate %232, %247, %262, %277 in 1 : vector<16x8xf32>, vector<16x8xf32>, vector<16x8xf32>, vector<16x8xf32> -> vector<16x32xf32>
    %cst_78 = arith.constant dense<0.000000e+00> : vector<16x32xf32>
    %279 = tpu.matmul %278, %182, %cst_78 {dimension_numbers = #tpu.dot_dimension_numbers<[1], [0], [0], [1], [0, 0, 1, 1], [], []>} : vector<16x32xf32>, vector<32x32xf32>, vector<16x32xf32> -> vector<16x32xf32>
    %280 = arith.addf %176, %279 : vector<16x32xf32>
    %281 = vector.broadcast %186 : vector<1x32xf32> to vector<16x32xf32>
    %282 = arith.addf %280, %281 : vector<16x32xf32>
    %cst_79 = arith.constant dense<0.000000e+00> : vector<16xf32>
    %283 = vector.multi_reduction <add>, %282, %cst_79 [1] : vector<16x32xf32> to vector<16xf32>
    %284 = vector.shape_cast %283 : vector<16xf32> to vector<16x1xf32>
    %cst_80 = arith.constant 3.200000e+01 : f32
    %285 = vector.broadcast %cst_80 : f32 to vector<16x1xf32>
    %286 = arith.divf %284, %285 : vector<16x1xf32>
    %287 = vector.broadcast %286 : vector<16x1xf32> to vector<16x32xf32>
    %288 = arith.subf %282, %287 : vector<16x32xf32>
    %289 = arith.mulf %288, %288 : vector<16x32xf32>
    %cst_81 = arith.constant dense<0.000000e+00> : vector<16xf32>
    %290 = vector.multi_reduction <add>, %289, %cst_81 [1] : vector<16x32xf32> to vector<16xf32>
    %291 = vector.shape_cast %290 : vector<16xf32> to vector<16x1xf32>
    %cst_82 = arith.constant 3.200000e+01 : f32
    %292 = vector.broadcast %cst_82 : f32 to vector<16x1xf32>
    %293 = arith.divf %291, %292 : vector<16x1xf32>
    %294 = vector.broadcast %286 : vector<16x1xf32> to vector<16x32xf32>
    %295 = arith.subf %282, %294 : vector<16x32xf32>
    %cst_83 = arith.constant 9.99999996E-13 : f32
    %296 = vector.broadcast %cst_83 : f32 to vector<16x1xf32>
    %297 = arith.addf %293, %296 : vector<16x1xf32>
    %298 = math.rsqrt %297 : vector<16x1xf32>
    %299 = vector.broadcast %298 : vector<16x1xf32> to vector<16x32xf32>
    %300 = arith.mulf %295, %299 : vector<16x32xf32>
    %301 = vector.broadcast %189 : vector<1x32xf32> to vector<16x32xf32>
    %302 = arith.mulf %300, %301 : vector<16x32xf32>
    %303 = vector.broadcast %190 : vector<1x32xf32> to vector<16x32xf32>
    %304 = arith.addf %302, %303 : vector<16x32xf32>
    %cst_84 = arith.constant dense<0.000000e+00> : vector<16x64xf32>
    %305 = tpu.matmul %304, %183, %cst_84 {dimension_numbers = #tpu.dot_dimension_numbers<[1], [0], [0], [1], [0, 0, 1, 1], [], []>} : vector<16x32xf32>, vector<32x64xf32>, vector<16x64xf32> -> vector<16x64xf32>
    %306 = vector.broadcast %191 : vector<1x64xf32> to vector<16x64xf32>
    %307 = arith.addf %305, %306 : vector<16x64xf32>
    %308 = arith.mulf %307, %307 : vector<16x64xf32>
    %309 = arith.mulf %307, %308 : vector<16x64xf32>
    %cst_85 = arith.constant 4.471500e-02 : f32
    %310 = vector.broadcast %cst_85 : f32 to vector<16x64xf32>
    %311 = arith.mulf %310, %309 : vector<16x64xf32>
    %312 = arith.addf %307, %311 : vector<16x64xf32>
    %cst_86 = arith.constant 0.797884583 : f32
    %313 = vector.broadcast %cst_86 : f32 to vector<16x64xf32>
    %314 = arith.mulf %313, %312 : vector<16x64xf32>
    %315 = math.tanh %314 : vector<16x64xf32>
    %cst_87 = arith.constant 1.000000e+00 : f32
    %316 = vector.broadcast %cst_87 : f32 to vector<16x64xf32>
    %317 = arith.addf %316, %315 : vector<16x64xf32>
    %cst_88 = arith.constant 5.000000e-01 : f32
    %318 = vector.broadcast %cst_88 : f32 to vector<16x64xf32>
    %319 = arith.mulf %318, %317 : vector<16x64xf32>
    %320 = arith.mulf %307, %319 : vector<16x64xf32>
    %cst_89 = arith.constant dense<0.000000e+00> : vector<16x32xf32>
    %321 = tpu.matmul %320, %184, %cst_89 {dimension_numbers = #tpu.dot_dimension_numbers<[1], [0], [0], [1], [0, 0, 1, 1], [], []>} : vector<16x64xf32>, vector<64x32xf32>, vector<16x32xf32> -> vector<16x32xf32>
    %322 = vector.broadcast %192 : vector<1x32xf32> to vector<16x32xf32>
    %323 = arith.addf %321, %322 : vector<16x32xf32>
    %324 = arith.addf %282, %323 : vector<16x32xf32>
    %325 = vector.extract_strided_slice %324 {offsets = [0, 0], sizes = [1, 32], strides = [1, 1]} : vector<16x32xf32> to vector<1x32xf32>
    %326 = vector.extract_strided_slice %324 {offsets = [5, 0], sizes = [1, 32], strides = [1, 1]} : vector<16x32xf32> to vector<1x32xf32>
    %327 = tpu.concatenate %325, %326 in 0 : vector<1x32xf32>, vector<1x32xf32> -> vector<2x32xf32>
    %c208 = arith.constant 208 : index
    %c0_90 = arith.constant 0 : index
    %328 = vector.load %arg3[%c208, %c0_90] : memref<210x32xf32, #tpu.memory_space<vmem>>, vector<1x32xf32>
    %c209 = arith.constant 209 : index
    %c0_91 = arith.constant 0 : index
    %329 = vector.load %arg3[%c209, %c0_91] : memref<210x32xf32, #tpu.memory_space<vmem>>, vector<1x32xf32>
    %cst_92 = arith.constant dense<0.000000e+00> : vector<2xf32>
    %330 = vector.multi_reduction <add>, %327, %cst_92 [1] : vector<2x32xf32> to vector<2xf32>
    %331 = vector.shape_cast %330 : vector<2xf32> to vector<2x1xf32>
    %cst_93 = arith.constant 3.200000e+01 : f32
    %332 = vector.broadcast %cst_93 : f32 to vector<2x1xf32>
    %333 = arith.divf %331, %332 : vector<2x1xf32>
    %334 = vector.broadcast %333 : vector<2x1xf32> to vector<2x32xf32>
    %335 = arith.subf %327, %334 : vector<2x32xf32>
    %336 = arith.mulf %335, %335 : vector<2x32xf32>
    %cst_94 = arith.constant dense<0.000000e+00> : vector<2xf32>
    %337 = vector.multi_reduction <add>, %336, %cst_94 [1] : vector<2x32xf32> to vector<2xf32>
    %338 = vector.shape_cast %337 : vector<2xf32> to vector<2x1xf32>
    %cst_95 = arith.constant 3.200000e+01 : f32
    %339 = vector.broadcast %cst_95 : f32 to vector<2x1xf32>
    %340 = arith.divf %338, %339 : vector<2x1xf32>
    %341 = vector.broadcast %333 : vector<2x1xf32> to vector<2x32xf32>
    %342 = arith.subf %327, %341 : vector<2x32xf32>
    %cst_96 = arith.constant 9.99999996E-13 : f32
    %343 = vector.broadcast %cst_96 : f32 to vector<2x1xf32>
    %344 = arith.addf %340, %343 : vector<2x1xf32>
    %345 = math.rsqrt %344 : vector<2x1xf32>
    %346 = vector.broadcast %345 : vector<2x1xf32> to vector<2x32xf32>
    %347 = arith.mulf %342, %346 : vector<2x32xf32>
    %348 = vector.broadcast %328 : vector<1x32xf32> to vector<2x32xf32>
    %349 = arith.mulf %347, %348 : vector<2x32xf32>
    %350 = vector.broadcast %329 : vector<1x32xf32> to vector<2x32xf32>
    %351 = arith.addf %349, %350 : vector<2x32xf32>
    %c0_97 = arith.constant 0 : index
    %c0_98 = arith.constant 0 : index
    %352 = vector.load %arg4[%c0_97, %c0_98] : memref<33x128xf32, #tpu.memory_space<vmem>>, vector<32x128xf32>
    %cst_99 = arith.constant dense<0.000000e+00> : vector<2x128xf32>
    %353 = tpu.matmul %351, %352, %cst_99 {dimension_numbers = #tpu.dot_dimension_numbers<[1], [0], [0], [1], [0, 0, 1, 1], [], []>} : vector<2x32xf32>, vector<32x128xf32>, vector<2x128xf32> -> vector<2x128xf32>
    %c32 = arith.constant 32 : index
    %c0_100 = arith.constant 0 : index
    %354 = vector.load %arg4[%c32, %c0_100] : memref<33x128xf32, #tpu.memory_space<vmem>>, vector<1x128xf32>
    %355 = vector.broadcast %354 : vector<1x128xf32> to vector<2x128xf32>
    %356 = arith.addf %353, %355 : vector<2x128xf32>
    %c0_101 = arith.constant 0 : index
    %c0_102 = arith.constant 0 : index
    %357 = vector.load %arg5[%c0_101, %c0_102] : memref<2x128xf32, #tpu.memory_space<vmem>>, vector<2x128xf32>
    tpu.vector_store %arg5[%c0_101, %c0_102], %356 {strides = array<i32>} : memref<2x128xf32, #tpu.memory_space<vmem>>, vector<2x128xf32>,
    return
  }
}

</mosaic_0001>

<bundles_post_ra>
// kernel: dino_vit_embedding_forward.1
= control target key start
LH: loop header
LB: loop body
LE: loop exit
PB: predicated region body
PF: predicated region fallthrough
CT: control target
= control target key end

     0   :  { %v3734_v3 = vmov 0.0|0.0   ;;  %vm51_vm0 = vcmask 523264   ;;  %s4428_s0 = inlined_call_operand.vmem [shape: f32[16,192], index: 0, kind: input, shape index: {}]   ;;  %s4429_s1 = inlined_call_operand.vmem [shape: f32[2,96,192], index: 1, kind: input, shape index: {}]   ;;  %s4430_s2 = inlined_call_operand.vmem [shape: f32[2,8,96], index: 2, kind: input, shape index: {}]   ;;  %s4431_s3 = inlined_call_operand.vmem [shape: f32[210,32], index: 3, kind: input, shape index: {}]   ;;  %s4432_s4 = inlined_call_operand.vmem [shape: f32[33,128], index: 4, kind: input, shape index: {}]   ;;  %s4433_s5 = inlined_call_operand.hbm [shape: f32[2,128], index: 5, kind: output, shape index: {}]  }
   0x1   :  { %v21_v0 = vld [vmem:[%s4431_s3] sm:$0xff]  ;;  %v22_v1 = vld [vmem:[%s4431_s3 + $0x8] sm:$0xff]  ;;  %v23_v2 = vld [vmem:[%s4431_s3 + $0x10] sm:$0xff]  ;;  %3296 = vmatprep.subr.bf16.mxu0 %v3734_v3 }
   0x2   :  { %v3297_v4 = vpack.c.bf16 %v22_v1, %v21_v0  ;;  %v24_v5 = vld [vmem:[%s4431_s3 + $0x18] sm:$0xff]  ;;  %v25_v7 = vld [vmem:[%s4431_s3 + $0x20] sm:$0xff]  ;;  %v26_v8 = vld [vmem:[%s4431_s3 + $0x28] sm:$0xff] }
   0x3   :  { %v3300_v6 = vpack.c.bf16 %v24_v5, %v23_v2  ;;  %v3303_v9 = vpack.c.bf16 %v26_v8, %v25_v7  ;;  %v27_v10 = vld [vmem:[%s4431_s3 + $0x30] sm:$0xff]  ;;  %v28_v11 = vld [vmem:[%s4431_s3 + $0x38] sm:$0xff]  ;;  %v48_v12 = vld [vmem:[%s4428_s0 + $0x8] sm:$0xff] }
   0x4   :  { %3298 = vmatpush1.bf16.msra.mxu0 %v3297_v4  ;;  %2857 = vmatprep.mubr.msk.f32.mxu0 %vm51_vm0, %v48_v12 }
   0x5   :  { %3299 = vmatprep.subr.bf16.mxu0 %v3734_v3 }
   0x8   :  { %3301 = vmatpush1.bf16.msra.mxu0 %v3300_v6 }
   0x9   :  { %3302 = vmatprep.subr.bf16.mxu0 %v3734_v3 }
   0xa   :  { %10 = vsyncpa [#allocation3], 0  ;;  %v3306_v13 = vpack.c.bf16 %v28_v11, %v27_v10  ;;  %v29_v14 = vld [vmem:[%s4431_s3 + $0x40] sm:$0xff]  ;;  %v30_v15 = vld [vmem:[%s4431_s3 + $0x48] sm:$0xff]  ;;  %vm171_vm1 = vcmask 261120   ;;  %v133_v7 = vlaneseq  ;;  %vm302_vm2 = vcmask 64512  }
   0xb   :  { %v3309_v16 = vpack.c.bf16 %v30_v15, %v29_v14  ;;  %v31_v17 = vld [vmem:[%s4431_s3 + $0x50] sm:$0xff]  ;;  %v32_v18 = vld [vmem:[%s4431_s3 + $0x58] sm:$0xff]  ;;  %v33_v20 = vld [vmem:[%s4431_s3 + $0x60] sm:$0xff]  ;;  %s3735_s12 = smov 64   ;;  %s3736_s13 = smov 96   ;;  %vm394_vm10 = vcmask 130048  }
   0xc   :  { %3304 = vmatpush1.bf16.msra.mxu0 %v3303_v9  ;;  %v3312_v19 = vpack.c.bf16 %v32_v18, %v31_v17  ;;  %v34_v21 = vld [vmem:[%s4431_s3 + $0x68] sm:$0xff]  ;;  %v35_v23 = vld [vmem:[%s4431_s3 + $0x70] sm:$0xff]  ;;  %v36_v24 = vld [vmem:[%s4431_s3 + $0x78] sm:$0xff]  ;;  %v3928_v11 = vshrl.u32 %v133_v7, 7  ;;  %s3737_s14 = smov 88   ;;  %s3738_s15 = smov 120  }
   0xd   :  { %3305 = vmatprep.subr.bf16.mxu0 %v3734_v3  ;;  %v3315_v22 = vpack.c.bf16 %v34_v21, %v33_v20  ;;  %v3318_v25 = vpack.c.bf16 %v36_v24, %v35_v23  ;;  %v37_v26 = vld [vmem:[%s4431_s3 + $0x80] sm:$0xff]  ;;  %v38_v27 = vld [vmem:[%s4431_s3 + $0x88] sm:$0xff]  ;;  %v39_v29 = vld [vmem:[%s4431_s3 + $0x90] sm:$0xff]  ;;  %s3742_s16 = smov 80   ;;  %s3743_s17 = smov 112   ;;  %vm1108_vm11 = vcmask 195584  }
   0xe   :  { %v3321_v28 = vpack.c.bf16 %v38_v27, %v37_v26  ;;  %v40_v30 = vld [vmem:[%s4431_s3 + $0x98] sm:$0xff]  ;;  %v41_v32 = vld [vmem:[%s4431_s3 + $0xa0] sm:$0xff]  ;;  %v42_v33 = vld [vmem:[%s4431_s3 + $0xa8] sm:$0xff]  ;;  %v207_v15 = vsub.s32 3, %v3928_v11  ;;  %v213_v26 = vsub.s32 0, %v3928_v11  ;;  %vm142_vm7 = vcmp.lt.s32.totalorder %v3928_v11, 5 }
   0xf   :  { %v3324_v31 = vpack.c.bf16 %v40_v30, %v39_v29  ;;  %v3327_v34 = vpack.c.bf16 %v42_v33, %v41_v32  ;;  %v43_v35 = vld [vmem:[%s4431_s3 + $0xb0] sm:$0xff]  ;;  %v44_v36 = vld [vmem:[%s4431_s3 + $0xb8] sm:$0xff]  ;;  %v47_v38 = vld [vmem:[%s4428_s0] sm:$0xff]  ;;  %s3744_s18 = smov 56   ;;  %s3745_s19 = smov 72   ;;  %vm2732_vm12 = vcmask 1040384  }
  0x10   :  { %3307 = vmatpush1.bf16.msra.mxu0 %v3306_v13  ;;  %v3330_v37 = vpack.c.bf16 %v44_v36, %v43_v35  ;;  %v50_v39 = vld [vmem:[%s4428_s0 + $0x18] sm:$0xff]  ;;  %v49_v40 = vld [vmem:[%s4428_s0 + $0x10] sm:$0xff]  ;;  %v45_v41 = vld [vmem:[%s4431_s3 + $0xc0] sm:$0xff]  ;;  %v201_v13 = vsub.s32 2, %v3928_v11  ;;  %s3746_s20 = smov 104   ;;  %s3747_s21 = smov 48  }
  0x11   :  { %3308 = vmatprep.subr.bf16.mxu0 %v3734_v3  ;;  %v46_v45 = vld [vmem:[%s4431_s3 + $0xc8] sm:$0xff]  ;;  %v3905_v61 = vld [vmem:[%s4429_s1] sm:$0xff]  ;;  %v3910_v62 = vld [vmem:[%s4429_s1 + $0x10] sm:$0xff]  ;;  %s3748_s22 = smov 32   ;;  %s3749_s23 = smov 40   ;;  %vm2736_vm13 = vcmask 254976  }
  0x12   :  { %v3915_v63 = vld [vmem:[%s4429_s1 + $0x20] sm:$0xff]  ;;  %v3560_v0 = vpack.i.bf16 %v3910_v62, %v3905_v61  ;;  %v3332_v1 = vpack.c.bf16 %v3910_v62, %v3905_v61  ;;  %v3924_v2 = vld [vmem:[%s4429_s1 + $0x30] sm:$0xff]  ;;  %vm3969_vm3 = vmpackc.low %vm302_vm2, %vm302_vm2  ;;  %s3750_s24 = smov 8   ;;  %s3751_s25 = smov 16   ;;  %vm3753_vm14 = vmmov 0  }
  0x13   :  { %v3336_v4 = vpack.c.bf16 %v3924_v2, %v3915_v63  ;;  %v3934_v14 = vld [vmem:[%s4430_s2] sm:$0xff]  ;;  %s3752_s26 = smov 24  }
  0x14   :  { %3310 = vmatpush1.bf16.msra.mxu0 %v3309_v16  ;;  %3333 = vmatprep.subr.bf16.mxu1 %v3332_v1  ;;  %v202_v16 = vrot.slane %v3934_v14, %v201_v13  ;;  %v214_v27 = vrot.slane %v3934_v14, %v213_v26 }
  0x15   :  { %3311 = vmatprep.subr.bf16.mxu0 %v3734_v3  ;;  %3335 = vmatpush3.bf16.msra.mxu1 %v3332_v1 }
  0x16   :  { %3337 = vmatprep.subr.bf16.mxu1 %v3336_v4 }
  0x18   :  { %3313 = vmatpush1.bf16.msra.mxu0 %v3312_v19  ;;  %v208_v19 = vrot.slane %v3934_v14, %v207_v15 }
  0x19   :  { %3314 = vmatprep.subr.bf16.mxu0 %v3734_v3  ;;  %3339 = vmatpush3.bf16.msra.mxu1 %v3336_v4 }
  0x1c   :  { %3316 = vmatpush1.bf16.msra.mxu0 %v3315_v22 }
  0x1d   :  { %3317 = vmatprep.subr.bf16.mxu0 %v3734_v3 }
  0x20   :  { %3319 = vmatpush1.bf16.msra.mxu0 %v3318_v25 }
  0x21   :  { %3320 = vmatprep.subr.bf16.mxu0 %v3734_v3 }
  0x24   :  { %3322 = vmatpush1.bf16.msra.mxu0 %v3321_v28 }
  0x25   :  { %3323 = vmatprep.subr.bf16.mxu0 %v3734_v3 }
  0x28   :  { %3325 = vmatpush1.bf16.msra.mxu0 %v3324_v31 }
  0x29   :  { %3326 = vmatprep.subr.bf16.mxu0 %v3734_v3 }
  0x2c   :  { %3328 = vmatpush1.bf16.msra.mxu0 %v3327_v34 }
  0x2d   :  { %3329 = vmatprep.subr.bf16.mxu0 %v3734_v3 }
  0x30   :  { %3331 = vmatpush1.bf16.msra.mxu0 %v3330_v37 }
  0x33   :  { %123 = vmatmul.mubr.f32.vlgmr.msra.gmra.mrb[0].mxu0 %v47_v38 }
  0x34   :  { %2858 = vmatprep.mubr.msk.f32.mxu0 %vm51_vm0, %v50_v39 }
  0x37   :  { %128 = vmatmul.mubr.f32.gmra.mrb[2].mxu0 %v49_v40 }
 0x106   :  { %v124_v42 = vpop.f32.mrb[0].mxu0 }
 0x107   :  { %v3887_v43 = vadd.f32 %v124_v42, %v45_v41  ;;  %v126_v44 = vpop.f32.mrb[1].mxu0 }
 0x109   :  { %v172_v46 = vsel %vm171_vm1, %v3887_v43, 0.0 }
 0x10a   :  { %v129_v47 = vpop.f32.mrb[2].mxu0  ;;  %173 = vadd.xlane.f32.xlu0 %v172_v46 }
 0x10b   :  { %v3894_v48 = vadd.f32 %v129_v47, %v46_v45  ;;  %v131_v49 = vpop.f32.mrb[3].mxu0  ;;  %v137_v47 = vand.u32 127, %v133_v7 }
 0x10c   :  { %v135_v49 = vadd.s32 8, %v3928_v11 }
 0x10d   :  { %v175_v50 = vsel %vm171_vm1, %v3894_v48, 0.0  ;;  %vm146_vm4 = vcmp.lt.s32.totalorder %v137_v47, 10  ;;  %vm148_vm6 = vcmp.lt.s32.totalorder %v137_v47, 5 }
 0x10e   :  { %176 = vadd.xlane.f32.xlu0 %v175_v50  ;;  %vm139_vm5 = vcmp.lt.s32.totalorder %v135_v49, 10  ;;  %v3739_v50 = vmov 2  }
 0x197   :  { %v174_v51 = vpop.xlane.xlu0 %173 }
 0x198   :  { %v179_v52 = vmul.f32 0.03125, %v174_v51  ;;  %v147_v51 = vsel %vm146_vm4, 1, %v3739_v50 }
 0x19a   :  { %v181_v53 = vsub.f32 %v3887_v43, %v179_v52  ;;  %v141_v52 = vsel %vm139_vm5, 1, %v3739_v50 }
 0x19b   :  { %v177_v54 = vpop.xlane.xlu0 %176 }
 0x19c   :  { %v180_v55 = vmul.f32 0.03125, %v177_v54  ;;  %v183_v56 = vmul.f32 %v181_v53, %v181_v53  ;;  %v3740_v54 = vmov 1  }
 0x19e   :  { %v182_v57 = vsub.f32 %v3894_v48, %v180_v55  ;;  %v185_v58 = vsel %vm171_vm1, %v183_v56, 0.0  ;;  %v144_v55 = vsel %vm142_vm7, 0, %v3740_v54  ;;  %v3741_v56 = vmov -10000.0  }
 0x19f   :  { %186 = vadd.xlane.f32.xlu1 %v185_v58 }
 0x1a0   :  { %v184_v59 = vmul.f32 %v182_v57, %v182_v57 }
 0x1a2   :  { %v188_v60 = vsel %vm171_vm1, %v184_v59, 0.0 }
 0x1a3   :  { %189 = vadd.xlane.f32.xlu1 %v188_v60 }
 0x22c   :  { %v187_v5 = vpop.xlane.xlu1 %186 }
 0x22d   :  { %v191_v6 = vmul.f32 0.03125, %v187_v5 }
 0x22f   :  { %v193_v8 = vadd.f32 1e-12, %v191_v6 }
 0x230   :  { %v190_v9 = vpop.xlane.xlu1 %189 }
 0x231   :  { %3620 = vrsqrt.f32 %v193_v8  ;;  %v192_v10 = vmul.f32 0.03125, %v190_v9 }
 0x233   :  { %v194_v12 = vadd.f32 1e-12, %v192_v10 }
 0x235   :  { %3622 = vrsqrt.f32 %v194_v12 }
 0x23b   :  { %v3621_v17 = vpop.eup %3620 }
 0x23c   :  { %v197_v18 = vmul.f32 %v3621_v17, %v181_v53  ;;  %v149_v53 = vsel %vm148_vm6, 0, %v147_v51 }
 0x23d   :  { %vm151_vm8 = vcmp.eq.s32.totalorder %v141_v52, %v149_v53  ;;  %vm150_vm9 = vcmp.eq.s32.totalorder %v144_v55, %v149_v53 }
 0x23e   :  { %v203_v20 = vmul.f32 %v202_v16, %v197_v18  ;;  %v3985_v60 = vsel %vm150_vm9, 0.0, %v3741_v56 }
 0x23f   :  { %v3623_v21 = vpop.eup %3622 }
 0x240   :  { %v198_v22 = vmul.f32 %v3623_v21, %v182_v57  ;;  %v209_v23 = vadd.f32 %v208_v19, %v203_v20  ;;  %v3983_v57 = vsel %vm151_vm8, 0.0, %v3741_v56 }
 0x242   :  { %v204_v24 = vmul.f32 %v202_v16, %v198_v22  ;;  %3077 = vmatprep.mubr.msk.f32.mxu1 %vm171_vm1, %v209_v23 }
 0x244   :  { %v210_v25 = vadd.f32 %v208_v19, %v204_v24 }
 0x246   :  { %3078 = vmatmul.mubr.msk.f32.vlgmr.msra.gmra.mrb[0].mxu1 %vm171_vm1, %v210_v25 }
 0x319   :  { %v3079_v28 = vpop.f32.mrb[0].mxu1 }
 0x31a   :  { %v3949_v29 = vadd.f32 %v3079_v28, %v214_v27  ;;  %v287_v30 = vpop.f32.mrb[1].mxu1 }
 0x31b   :  { %v3951_v31 = vadd.f32 %v287_v30, %v214_v27 }
 0x31d   :  { %3084 = vmatprep.mubr.msk.f32.mxu1 %vm302_vm2, %v3951_v31  ;;  %v3957_v32 = vpack.i.bf16 %v3949_v29, %v3951_v31 }
 0x31f   :  { %3526 = vrot.lane.b32.xlu1 %v3957_v32, %s3735_s12  ;;  %3521 = vrot.lane.b32.xlu0 %v3957_v32, %s3736_s13 }
 0x323   :  { %3531 = vrot.lane.b32.xlu0 %v3957_v32, %s3737_s14 }
 0x327   :  { %494 = vrot.lane.b32.xlu0 %v3949_v29, %s3738_s15 }
 0x391   :  { %v3527_v33 = vpop.permute.xlu1 %3526  ;;  %v3522_v34 = vpop.permute.xlu0 %3521 }
 0x392   :  { %v3529_v35 = vunpack.i.h.bf16 %v3527_v33  ;;  %v3528_v36 = vunpack.i.l.bf16 %v3527_v33  ;;  %v3524_v37 = vunpack.i.h.bf16 %v3522_v34  ;;  %v3523_v38 = vunpack.i.l.bf16 %v3522_v34 }
 0x394   :  { %v3340_v40 = vpack.c.bf16 %v3524_v37, %v3523_v38  ;;  %v3346_v41 = vpack.c.bf16 %v3529_v35, %v3528_v36 }
 0x395   :  { %v3532_v42 = vpop.permute.xlu0 %3531 }
 0x396   :  { %3342 = vmatprep.subr.msk.bf16.mxu1 %vm3969_vm3, %v3340_v40  ;;  %v3534_v44 = vunpack.i.h.bf16 %v3532_v42  ;;  %v3533_v45 = vunpack.i.l.bf16 %v3532_v42 }
 0x397   :  { %3345 = vmatpush3.bf16.xpose.msk.msra.mxu1 %vm3969_vm3, %v3340_v40 }
 0x398   :  { %3347 = vmatprep.subr.bf16.mxu1 %v3346_v41  ;;  %v3350_v46 = vpack.c.bf16 %v3534_v44, %v3533_v45 }
 0x399   :  { %v495_v24 = vpop.permute.xlu0 %494 }
 0x39e   :  { %3085 = vmatmul.mubr.msk.f32.vlgmr.msra.gmra.mrb[2].mxu1 %vm302_vm2, %v3949_v29 }
 0x39f   :  { %3349 = vmatpush3.bf16.msra.mxu1 %v3346_v41 }
 0x3a0   :  { %3352 = vmatprep.subr.msk.bf16.mxu1 %vm3969_vm3, %v3350_v46 }
 0x471   :  { %v3086_v58 = vpop.f32.mrb[2].mxu1 }
 0x472   :  { %v387_v59 = vmul.f32 0.35355338, %v3086_v58  ;;  %v377_v1 = vpop.f32.mrb[3].mxu1 }
 0x473   :  { %v386_v4 = vmul.f32 0.35355338, %v377_v1 }
 0x474   :  { %v389_v5 = vadd.f32 %v387_v59, %v3983_v57 }
 0x475   :  { %v388_v6 = vadd.f32 %v386_v4, %v3985_v60 }
 0x476   :  { %v392_v7 = vmul.f32 1.442695, %v389_v5 }
 0x477   :  { %v390_v8 = vmul.f32 1.442695, %v388_v6 }
 0x478   :  { %3624 = vpow2.f32 %v392_v7 }
 0x479   :  { %3626 = vpow2.f32 %v390_v8 }
 0x482   :  { %v3625_v9 = vpop.eup %3624 }
 0x483   :  { %v398_v10 = vsel %vm394_vm10, %v3625_v9, 0.0  ;;  %v3627_v12 = vpop.eup %3626 }
 0x484   :  { %399 = vadd.xlane.f32.xlu1 %v398_v10  ;;  %v395_v16 = vsel %vm394_vm10, %v3627_v12, 0.0 }
 0x488   :  { %396 = vadd.xlane.f32.xlu1 %v395_v16 }
 0x499   :  { %492 = vrot.lane.b32.xlu1 %v3951_v31, %s3738_s15 }
 0x49d   :  { %3541 = vrot.lane.b32.xlu1 %v3957_v32, %s3742_s16 }
 0x511   :  { %v400_v17 = vpop.xlane.xlu1 %399 }
 0x512   :  { %3628 = vrcp.f32 %v400_v17 }
 0x515   :  { %v397_v18 = vpop.xlane.xlu1 %396 }
 0x516   :  { %3630 = vrcp.f32 %v397_v18 }
 0x519   :  { %v493_v23 = vpop.permute.xlu1 %492 }
 0x51c   :  { %v3629_v19 = vpop.eup %3628 }
 0x51d   :  { %v404_v22 = vmul.f32 %v3629_v19, %v3625_v9  ;;  %v3542_v45 = vpop.permute.xlu1 %3541 }
 0x51e   :  { %v3544_v50 = vunpack.i.h.bf16 %v3542_v45  ;;  %v3543_v51 = vunpack.i.l.bf16 %v3542_v45 }
 0x520   :  { %v3631_v20 = vpop.eup %3630  ;;  %v3360_v55 = vpack.c.bf16 %v3544_v50, %v3543_v51 }
 0x521   :  { %v403_v21 = vmul.f32 %v3631_v20, %v3627_v12 }
 0x523   :  { %3091 = vmatprep.mubr.msk.f32.mxu1 %vm394_vm10, %v403_v21 }
 0x524   :  { %3092 = vmatmul.mubr.msk.f32.vlgmr.msra.gmra.mrb[4].mxu1 %vm394_vm10, %v404_v22 }
 0x525   :  { %3355 = vmatpush3.bf16.xpose.msk.msra.mxu1 %vm3969_vm3, %v3350_v46  ;;  %3098 = vmatprep.mubr.msk.f32.mxu1 %vm302_vm2, %v493_v23 }
 0x52c   :  { %3099 = vmatmul.mubr.msk.f32.vlgmr.msra.gmra.mrb[6].mxu1 %vm302_vm2, %v495_v24 }
 0x5f7   :  { %v4001_v25 = vpop.f32.mrb[4].mxu1 }
 0x5f8   :  { %v4003_v27 = vpop.f32.mrb[5].mxu1 }
 0x5ff   :  { %v3100_v28 = vpop.f32.mrb[6].mxu1 }
 0x600   :  { %v584_v30 = vmul.f32 0.35355338, %v3100_v28  ;;  %v574_v33 = vpop.f32.mrb[7].mxu1 }
 0x601   :  { %v583_v34 = vmul.f32 0.35355338, %v574_v33 }
 0x602   :  { %v586_v35 = vadd.f32 %v584_v30, %v3983_v57 }
 0x603   :  { %v585_v36 = vadd.f32 %v583_v34, %v3985_v60 }
 0x604   :  { %v589_v37 = vmul.f32 1.442695, %v586_v35 }
 0x605   :  { %v587_v38 = vmul.f32 1.442695, %v585_v36 }
 0x606   :  { %3632 = vpow2.f32 %v589_v37 }
 0x607   :  { %3634 = vpow2.f32 %v587_v38 }
 0x610   :  { %v3633_v40 = vpop.eup %3632 }
 0x611   :  { %v3635_v41 = vpop.eup %3634  ;;  %v594_v42 = vsel %vm394_vm10, %v3633_v40, 0.0 }
 0x612   :  { %595 = vadd.xlane.f32.xlu0 %v594_v42  ;;  %v591_v44 = vsel %vm394_vm10, %v3635_v41, 0.0 }
 0x613   :  { %592 = vadd.xlane.f32.xlu1 %v591_v44 }
 0x624   :  { %688 = vrot.lane.b32.xlu1 %v3951_v31, %s3743_s17 }
 0x628   :  { %3536 = vrot.lane.b32.xlu0 %v3957_v32, %s3744_s18  ;;  %3551 = vrot.lane.b32.xlu1 %v3957_v32, %s3745_s19 }
 0x62c   :  { %690 = vrot.lane.b32.xlu0 %v3949_v29, %s3743_s17 }
 0x69f   :  { %v596_v46 = vpop.xlane.xlu0 %595 }
 0x6a0   :  { %3636 = vrcp.f32 %v596_v46  ;;  %v593_v47 = vpop.xlane.xlu1 %592 }
 0x6a1   :  { %3638 = vrcp.f32 %v593_v47 }
 0x6a3   :  { %v3537_v49 = vpop.permute.xlu0 %3536 }
 0x6a4   :  { %v3539_v52 = vunpack.i.h.bf16 %v3537_v49  ;;  %v3538_v53 = vunpack.i.l.bf16 %v3537_v49  ;;  %v689_v4 = vpop.permute.xlu1 %688 }
 0x6a6   :  { %v3356_v54 = vpack.c.bf16 %v3539_v52, %v3538_v53 }
 0x6a7   :  { %v691_v5 = vpop.permute.xlu0 %690 }
 0x6a8   :  { %3357 = vmatprep.subr.bf16.mxu1 %v3356_v54  ;;  %v3552_v24 = vpop.permute.xlu1 %3551 }
 0x6a9   :  { %3359 = vmatpush3.bf16.msra.mxu1 %v3356_v54  ;;  %v3554_v34 = vunpack.i.h.bf16 %v3552_v24  ;;  %v3553_v35 = vunpack.i.l.bf16 %v3552_v24 }
 0x6aa   :  { %v3637_v56 = vpop.eup %3636  ;;  %3362 = vmatprep.subr.msk.bf16.mxu1 %vm3969_vm3, %v3360_v55 }
 0x6ab   :  { %v3639_v58 = vpop.eup %3638  ;;  %v600_v1 = vmul.f32 %v3637_v56, %v3633_v40  ;;  %v3370_v40 = vpack.c.bf16 %v3554_v34, %v3553_v35 }
 0x6ac   :  { %v599_v59 = vmul.f32 %v3639_v58, %v3635_v41 }
 0x6ae   :  { %3105 = vmatprep.mubr.msk.f32.mxu1 %vm394_vm10, %v599_v59 }
 0x6af   :  { %3106 = vmatmul.mubr.msk.f32.vlgmr.msra.gmra.mrb[8].mxu1 %vm394_vm10, %v600_v1 }
 0x6b0   :  { %3112 = vmatprep.mubr.msk.f32.mxu1 %vm302_vm2, %v689_v4 }
 0x6b2   :  { %3365 = vmatpush3.bf16.xpose.msk.msra.mxu1 %vm3969_vm3, %v3360_v55 }
 0x6b9   :  { %3113 = vmatmul.mubr.msk.f32.vlgmr.msra.gmra.mrb[10].mxu1 %vm302_vm2, %v691_v5  ;;  %v3565_v5 = vpack.i.bf16 %v3924_v2, %v3915_v63 }
 0x782   :  { %v4025_v6 = vpop.f32.mrb[8].mxu1 }
 0x783   :  { %v4027_v7 = vpop.f32.mrb[9].mxu1 }
 0x78c   :  { %v3114_v8 = vpop.f32.mrb[10].mxu1 }
 0x78d   :  { %v780_v9 = vmul.f32 0.35355338, %v3114_v8  ;;  %v770_v10 = vpop.f32.mrb[11].mxu1 }
 0x78e   :  { %v779_v12 = vmul.f32 0.35355338, %v770_v10 }
 0x78f   :  { %v782_v16 = vadd.f32 %v780_v9, %v3983_v57 }
 0x790   :  { %v781_v17 = vadd.f32 %v779_v12, %v3985_v60 }
 0x791   :  { %v785_v18 = vmul.f32 1.442695, %v782_v16 }
 0x792   :  { %v783_v19 = vmul.f32 1.442695, %v781_v17 }
 0x793   :  { %3640 = vpow2.f32 %v785_v18 }
 0x794   :  { %3642 = vpow2.f32 %v783_v19 }
 0x79d   :  { %v3641_v20 = vpop.eup %3640 }
 0x79e   :  { %v3643_v21 = vpop.eup %3642  ;;  %v790_v22 = vsel %vm394_vm10, %v3641_v20, 0.0 }
 0x79f   :  { %791 = vadd.xlane.f32.xlu0 %v790_v22  ;;  %v787_v23 = vsel %vm394_vm10, %v3643_v21, 0.0 }
 0x7a0   :  { %788 = vadd.xlane.f32.xlu1 %v787_v23 }
 0x7b1   :  { %884 = vrot.lane.b32.xlu1 %v3951_v31, %s3746_s20 }
 0x7b5   :  { %3546 = vrot.lane.b32.xlu0 %v3957_v32, %s3747_s21 }
 0x7b9   :  { %886 = vrot.lane.b32.xlu0 %v3949_v29, %s3746_s20 }
 0x82c   :  { %v792_v28 = vpop.xlane.xlu0 %791 }
 0x82d   :  { %3644 = vrcp.f32 %v792_v28  ;;  %v789_v30 = vpop.xlane.xlu1 %788 }
 0x82e   :  { %3646 = vrcp.f32 %v789_v30 }
 0x830   :  { %v3547_v33 = vpop.permute.xlu0 %3546 }
 0x831   :  { %v3549_v36 = vunpack.i.h.bf16 %v3547_v33  ;;  %v3548_v37 = vunpack.i.l.bf16 %v3547_v33  ;;  %v885_v44 = vpop.permute.xlu1 %884 }
 0x833   :  { %v3366_v38 = vpack.c.bf16 %v3549_v36, %v3548_v37 }
 0x834   :  { %v887_v45 = vpop.permute.xlu0 %886 }
 0x835   :  { %3367 = vmatprep.subr.bf16.mxu1 %v3366_v38 }
 0x836   :  { %3369 = vmatpush3.bf16.msra.mxu1 %v3366_v38 }
 0x837   :  { %v3645_v31 = vpop.eup %3644  ;;  %3372 = vmatprep.subr.msk.bf16.mxu1 %vm3969_vm3, %v3370_v40 }
 0x838   :  { %v3647_v41 = vpop.eup %3646  ;;  %v796_v42 = vmul.f32 %v3645_v31, %v3641_v20 }
 0x839   :  { %v795_v29 = vmul.f32 %v3647_v41, %v3643_v21 }
 0x83b   :  { %3119 = vmatprep.mubr.msk.f32.mxu1 %vm394_vm10, %v795_v29  ;;  %v1212_v29 = vsub.s32 1, %v3928_v11 }
 0x83c   :  { %3120 = vmatmul.mubr.msk.f32.vlgmr.msra.gmra.mrb[12].mxu1 %vm394_vm10, %v796_v42 }
 0x83d   :  { %3126 = vmatprep.mubr.msk.f32.mxu1 %vm302_vm2, %v885_v44 }
 0x83f   :  { %3375 = vmatpush3.bf16.xpose.msk.msra.mxu1 %vm3969_vm3, %v3370_v40 }
 0x846   :  { %3127 = vmatmul.mubr.msk.f32.vlgmr.msra.gmra.mrb[14].mxu1 %vm302_vm2, %v887_v45 }
 0x90f   :  { %v3121_v46 = vpop.f32.mrb[12].mxu1 }
 0x910   :  { %v875_v47 = vpop.f32.mrb[13].mxu1 }
 0x919   :  { %v3128_v49 = vpop.f32.mrb[14].mxu1 }
 0x91a   :  { %v976_v50 = vmul.f32 0.35355338, %v3128_v49  ;;  %v966_v51 = vpop.f32.mrb[15].mxu1 }
 0x91b   :  { %v975_v52 = vmul.f32 0.35355338, %v966_v51 }
 0x91c   :  { %v978_v53 = vadd.f32 %v976_v50, %v3983_v57 }
 0x91d   :  { %v977_v54 = vadd.f32 %v975_v52, %v3985_v60 }
 0x91e   :  { %v981_v55 = vmul.f32 1.442695, %v978_v53 }
 0x91f   :  { %v979_v56 = vmul.f32 1.442695, %v977_v54 }
 0x920   :  { %3648 = vpow2.f32 %v981_v55 }
 0x921   :  { %3650 = vpow2.f32 %v979_v56 }
 0x92a   :  { %v3649_v58 = vpop.eup %3648 }
 0x92b   :  { %v3651_v59 = vpop.eup %3650  ;;  %v986_v1 = vsel %vm394_vm10, %v3649_v58, 0.0 }
 0x92c   :  { %987 = vadd.xlane.f32.xlu0 %v986_v1  ;;  %v983_v4 = vsel %vm394_vm10, %v3651_v59, 0.0  ;;  %v155_v1 = vld [vmem:[%s4429_s1 + $0x8] sm:$0xff] }
 0x92d   :  { %984 = vadd.xlane.f32.xlu1 %v983_v4  ;;  %v157_v4 = vld [vmem:[%s4429_s1 + $0x18] sm:$0xff] }
 0x93e   :  { %3561 = vrot.lane.b32.xlu1 %v3560_v0, %s3748_s22 }
 0x942   :  { %3556 = vrot.lane.b32.xlu0 %v3957_v32, %s3749_s23  ;;  %3566 = vrot.lane.b32.xlu1 %v3565_v5, %s3748_s22  ;;  %v3388_v5 = vpack.c.bf16 %v157_v4, %v155_v1 }
 0x946   :  { %1082 = vrot.lane.b32.xlu0 %v4027_v7, %s3750_s24  ;;  %1084 = vrot.lane.b32.xlu1 %v4025_v6, %s3750_s24 }
 0x94a   :  { %1090 = vrot.lane.b32.xlu0 %v875_v47, %s3751_s25  ;;  %1092 = vrot.lane.b32.xlu1 %v3121_v46, %s3751_s25 }
 0x9b9   :  { %v988_v61 = vpop.xlane.xlu0 %987 }
 0x9ba   :  { %3652 = vrcp.f32 %v988_v61  ;;  %v985_v62 = vpop.xlane.xlu1 %984  ;;  %v159_v61 = vld [vmem:[%s4429_s1 + $0x28] sm:$0xff] }
 0x9bb   :  { %3654 = vrcp.f32 %v985_v62  ;;  %v161_v62 = vld [vmem:[%s4429_s1 + $0x38] sm:$0xff] }
 0x9bd   :  { %v3557_v63 = vpop.permute.xlu0 %3556 }
 0x9be   :  { %v3559_v0 = vunpack.i.h.bf16 %v3557_v63  ;;  %v3558_v2 = vunpack.i.l.bf16 %v3557_v63  ;;  %v3562_v32 = vpop.permute.xlu1 %3561  ;;  %v3392_v63 = vpack.c.bf16 %v161_v62, %v159_v61 }
 0x9bf   :  { %v3564_v8 = vunpack.i.h.bf16 %v3562_v32  ;;  %v3563_v9 = vunpack.i.l.bf16 %v3562_v32 }
 0x9c0   :  { %v3376_v10 = vpack.c.bf16 %v3559_v0, %v3558_v2 }
 0x9c1   :  { %v3380_v7 = vpack.c.bf16 %v3564_v8, %v3563_v9  ;;  %v1083_v28 = vpop.permute.xlu0 %1082 }
 0x9c2   :  { %3377 = vmatprep.subr.bf16.mxu0 %v3376_v10  ;;  %v3567_v12 = vpop.permute.xlu1 %3566  ;;  %v1104_v34 = vsel %vm302_vm2, %v4003_v27, %v1083_v28  ;;  %v1213_v27 = vrot.slane %v3934_v14, %v1212_v29  ;;  %v162_v28 = vld [vmem:[%s4429_s1 + $0x40] sm:$0xff] }
 0x9c3   :  { %v3569_v6 = vunpack.i.h.bf16 %v3567_v12  ;;  %v3568_v16 = vunpack.i.l.bf16 %v3567_v12  ;;  %3379 = vmatpush3.bf16.msra.mxu0 %v3376_v10  ;;  %3381 = vmatprep.subr.bf16.mxu1 %v3380_v7  ;;  %v1250_v12 = vsub.s32 5, %v3928_v11 }
 0x9c4   :  { %v3653_v17 = vpop.eup %3652  ;;  %3383 = vmatpush3.bf16.msra.mxu1 %v3380_v7  ;;  %3389 = vmatprep.subr.bf16.mxu0 %v3388_v5  ;;  %v1244_v7 = vsub.s32 4, %v3928_v11 }
 0x9c5   :  { %v3655_v18 = vpop.eup %3654  ;;  %v3384_v19 = vpack.c.bf16 %v3569_v6, %v3568_v16  ;;  %v992_v21 = vmul.f32 %v3653_v17, %v3649_v58  ;;  %v1091_v33 = vpop.permute.xlu0 %1090 }
 0x9c6   :  { %v991_v20 = vmul.f32 %v3655_v18, %v3651_v59  ;;  %v1085_v24 = vpop.permute.xlu1 %1084  ;;  %v1106_v36 = vsel %vm394_vm10, %v1104_v34, %v1091_v33  ;;  %v1245_v6 = vrot.slane %v3934_v14, %v1244_v7  ;;  %v1251_v18 = vrot.slane %v3934_v14, %v1250_v12  ;;  %v164_v34 = vld [vmem:[%s4429_s1 + $0x60] sm:$0xff] }
 0x9c7   :  { %3385 = vmatprep.subr.bf16.mxu1 %v3384_v19  ;;  %v1105_v37 = vsel %vm302_vm2, %v4001_v25, %v1085_v24 }
 0x9c8   :  { %3133 = vmatprep.mubr.msk.f32.mxu0 %vm394_vm10, %v991_v20  ;;  %3387 = vmatpush3.bf16.msra.mxu1 %v3384_v19 }
 0x9c9   :  { %3134 = vmatmul.mubr.msk.f32.vlgmr.msra.gmra.mrb[4].mxu0 %vm394_vm10, %v992_v21 }
 0x9ca   :  { %v1093_v30 = vpop.permute.xlu1 %1092  ;;  %3391 = vmatpush3.bf16.msra.mxu0 %v3388_v5 }
 0x9cb   :  { %v1107_v40 = vsel %vm394_vm10, %v1105_v37, %v1093_v30  ;;  %3393 = vmatprep.subr.bf16.mxu0 %v3392_v63  ;;  %v163_v30 = vld [vmem:[%s4429_s1 + $0x50] sm:$0xff]  ;;  %v166_v37 = vld [vmem:[%s4429_s1 + $0x80] sm:$0xff] }
 0x9cc   :  { %v3396_v33 = vpack.c.bf16 %v163_v30, %v162_v28 }
 0x9ce   :  { %3395 = vmatpush3.bf16.msra.mxu0 %v3392_v63  ;;  %3397 = vmatprep.subr.bf16.mxu1 %v3396_v33 }
 0xa9c   :  { %v3135_v22 = vpop.f32.mrb[4].mxu0 }
 0xa9d   :  { %1100 = vrot.lane.b32.xlu1 %v3135_v22, %s3752_s26  ;;  %v1071_v23 = vpop.f32.mrb[5].mxu0 }
 0xa9e   :  { %1098 = vrot.lane.b32.xlu0 %v1071_v23, %s3752_s26 }
 0xb0f   :  { %v1101_v35 = vpop.permute.xlu1 %1100 }
 0xb10   :  { %v1099_v38 = vpop.permute.xlu0 %1098  ;;  %v1110_v41 = vsel %vm1108_vm11, %v1107_v40, %v1101_v35  ;;  %v165_v35 = vld [vmem:[%s4429_s1 + $0x70] sm:$0xff] }
 0xb11   :  { %v1109_v31 = vsel %vm1108_vm11, %v1106_v36, %v1099_v38  ;;  %v3400_v36 = vpack.c.bf16 %v165_v35, %v164_v34  ;;  %v167_v38 = vld [vmem:[%s4429_s1 + $0x90] sm:$0xff]  ;;  %v4171_v34 = vld [vmem:[%s4429_s1 + $0xc0] sm:$0xff] }
 0xb12   :  { %3144 = vmatprep.mubr.msk.f32.mxu1 %vm171_vm1, %v1109_v31  ;;  %v3404_v40 = vpack.c.bf16 %v167_v38, %v166_v37  ;;  %v168_v31 = vld [vmem:[%s4429_s1 + $0xa0] sm:$0xff]  ;;  %v4176_v35 = vld [vmem:[%s4429_s1 + $0xd0] sm:$0xff] }
 0xb13   :  { %3145 = vmatmul.mubr.msk.f32.vlgmr.msra.gmra.mrb[16].mxu1 %vm171_vm1, %v1110_v41  ;;  %v169_v41 = vld [vmem:[%s4429_s1 + $0xb0] sm:$0xff]  ;;  %v4183_v37 = vld [vmem:[%s4429_s1 + $0xe0] sm:$0xff] }
 0xb14   :  { %3399 = vmatpush3.bf16.msra.mxu1 %v3396_v33  ;;  %v4188_v38 = vld [vmem:[%s4429_s1 + $0xf0] sm:$0xff] }
 0xb15   :  { %3401 = vmatprep.subr.bf16.mxu1 %v3400_v36 }
 0xb18   :  { %3403 = vmatpush3.bf16.msra.mxu1 %v3400_v36  ;;  %v3412_v36 = vpack.c.bf16 %v4176_v35, %v4171_v34 }
 0xb19   :  { %3405 = vmatprep.subr.bf16.mxu1 %v3404_v40 }
 0xb1a   :  { %3413 = vmatprep.subr.bf16.mxu0 %v3412_v36 }
 0xb1c   :  { %3407 = vmatpush3.bf16.msra.mxu1 %v3404_v40  ;;  %v3416_v40 = vpack.c.bf16 %v4188_v38, %v4183_v37 }
 0xbe6   :  { %v3146_v42 = vpop.f32.mrb[16].mxu1 }
 0xbe7   :  { %v1209_v25 = vadd.f32 %v3146_v42, %v3894_v48  ;;  %v1199_v44 = vpop.f32.mrb[17].mxu1  ;;  %v1256_v42 = vsub.s32 6, %v3928_v11 }
 0xbe8   :  { %v1208_v45 = vadd.f32 %v1199_v44, %v3887_v43 }
 0xbe9   :  { %v4086_v46 = vadd.f32 %v1213_v27, %v1209_v25  ;;  %v1257_v25 = vrot.slane %v3934_v14, %v1256_v42 }
 0xbea   :  { %v4088_v47 = vadd.f32 %v1213_v27, %v1208_v45  ;;  %v3408_v27 = vpack.c.bf16 %v169_v41, %v168_v31 }
 0xbeb   :  { %v1219_v49 = vsel %vm171_vm1, %v4086_v46, 0.0 }
 0xbec   :  { %1220 = vadd.xlane.f32.xlu1 %v1219_v49  ;;  %v1216_v50 = vsel %vm171_vm1, %v4088_v47, 0.0  ;;  %3409 = vmatprep.subr.bf16.mxu1 %v3408_v27 }
 0xbed   :  { %1217 = vadd.xlane.f32.xlu0 %v1216_v50  ;;  %3411 = vmatpush3.bf16.msra.mxu1 %v3408_v27 }
 0xc79   :  { %v1221_v51 = vpop.xlane.xlu1 %1220 }
 0xc7a   :  { %v1223_v52 = vmul.f32 0.03125, %v1221_v51  ;;  %v1218_v53 = vpop.xlane.xlu0 %1217 }
 0xc7b   :  { %v1222_v54 = vmul.f32 0.03125, %v1218_v53 }
 0xc7c   :  { %v1225_v48 = vsub.f32 %v4086_v46, %v1223_v52 }
 0xc7d   :  { %v1224_v43 = vsub.f32 %v4088_v47, %v1222_v54 }
 0xc7e   :  { %v1227_v58 = vmul.f32 %v1225_v48, %v1225_v48 }
 0xc7f   :  { %v1226_v55 = vmul.f32 %v1224_v43, %v1224_v43 }
 0xc80   :  { %v1231_v59 = vsel %vm171_vm1, %v1227_v58, 0.0 }
 0xc81   :  { %v1228_v56 = vsel %vm171_vm1, %v1226_v55, 0.0 }
 0xc82   :  { %1229 = vadd.xlane.f32.xlu0 %v1228_v56 }
 0xc86   :  { %1232 = vadd.xlane.f32.xlu0 %v1231_v59 }
 0xd0f   :  { %v1230_v0 = vpop.xlane.xlu0 %1229 }
 0xd10   :  { %v1234_v2 = vmul.f32 0.03125, %v1230_v0 }
 0xd12   :  { %v1236_v32 = vadd.f32 1e-12, %v1234_v2 }
 0xd13   :  { %v1233_v8 = vpop.xlane.xlu0 %1232 }
 0xd14   :  { %3656 = vrsqrt.f32 %v1236_v32  ;;  %v1235_v9 = vmul.f32 0.03125, %v1233_v8  ;;  %v1359_v32 = vsub.s32 7, %v3928_v11  ;;  %v2760_v11 = vld [vmem:[%s4432_s4] sm:$0xff] }
 0xd16   :  { %v1237_v10 = vadd.f32 1e-12, %v1235_v9  ;;  %v1360_v8 = vrot.slane %v3934_v14, %v1359_v32 }
 0xd18   :  { %3658 = vrsqrt.f32 %v1237_v10 }
 0xd1e   :  { %v3657_v16 = vpop.eup %3656 }
 0xd1f   :  { %v1240_v17 = vmul.f32 %v3657_v16, %v1224_v43 }
 0xd21   :  { %v1246_v19 = vmul.f32 %v1245_v6, %v1240_v17 }
 0xd22   :  { %v3659_v20 = vpop.eup %3658 }
 0xd23   :  { %v1241_v21 = vmul.f32 %v3659_v20, %v1225_v48  ;;  %v1252_v22 = vadd.f32 %v1251_v18, %v1246_v19 }
 0xd25   :  { %v1247_v23 = vmul.f32 %v1245_v6, %v1241_v21  ;;  %3155 = vmatprep.mubr.msk.f32.mxu0 %vm171_vm1, %v1252_v22 }
 0xd27   :  { %v1253_v24 = vadd.f32 %v1251_v18, %v1247_v23 }
 0xd29   :  { %3156 = vmatmul.mubr.msk.f32.vlgmr.msra.gmra.mrb[6].mxu0 %vm171_vm1, %v1253_v24 }
 0xd2a   :  { %3415 = vmatpush3.bf16.msra.mxu0 %v3412_v36 }
 0xd2b   :  { %3417 = vmatprep.subr.bf16.mxu0 %v3416_v40 }
 0xd2e   :  { %3419 = vmatpush3.bf16.msra.mxu0 %v3416_v40 }
 0xdfc   :  { %v3157_v44 = vpop.f32.mrb[6].mxu0 }
 0xdfd   :  { %v1336_v45 = vadd.f32 %v3157_v44, %v1257_v25  ;;  %v1330_v49 = vpop.f32.mrb[7].mxu0 }
 0xdfe   :  { %v1331_v50 = vadd.f32 %v1330_v49, %v1257_v25  ;;  %v4195_v49 = vld [vmem:[%s4430_s2 + $0x8] sm:$0xff] }
 0xdff   :  { %v1340_v51 = vmul.f32 %v1336_v45, %v1336_v45 }
 0xe00   :  { %v1339_v52 = vmul.f32 %v1331_v50, %v1331_v50 }
 0xe01   :  { %v1342_v53 = vmul.f32 %v1340_v51, %v1336_v45 }
 0xe02   :  { %v1341_v54 = vmul.f32 %v1339_v52, %v1331_v50 }
 0xe03   :  { %v1344_v48 = vmul.f32 0.044715, %v1342_v53  ;;  %v1498_v53 = vrot.slane %v4195_v49, %v207_v15 }
 0xe04   :  { %v1343_v43 = vmul.f32 0.044715, %v1341_v54 }
 0xe05   :  { %v1346_v55 = vadd.f32 %v1344_v48, %v1336_v45 }
 0xe06   :  { %v1345_v56 = vadd.f32 %v1343_v43, %v1331_v50 }
 0xe07   :  { %v1348_v58 = vmul.f32 0.7978846, %v1346_v55 }
 0xe08   :  { %v1347_v59 = vmul.f32 0.7978846, %v1345_v56 }
 0xe09   :  { %3660 = vtanh.f32 %v1348_v58 }
 0xe0a   :  { %3662 = vtanh.f32 %v1347_v59 }
 0xe13   :  { %v3661_v1 = vpop.eup %3660 }
 0xe14   :  { %v3663_v4 = vpop.eup %3662  ;;  %v1352_v5 = vadd.f32 1.0, %v3661_v1 }
 0xe15   :  { %v1351_v61 = vadd.f32 1.0, %v3663_v4 }
 0xe16   :  { %v1354_v62 = vmul.f32 0.5, %v1352_v5 }
 0xe17   :  { %v1353_v63 = vmul.f32 0.5, %v1351_v61 }
 0xe18   :  { %v1356_v2 = vmul.f32 %v1354_v62, %v1336_v45 }
 0xe19   :  { %v1355_v0 = vmul.f32 %v1353_v63, %v1331_v50  ;;  %v1492_v50 = vrot.slane %v4195_v49, %v201_v13  ;;  %v1504_v13 = vrot.slane %v4195_v49, %v213_v26 }
 0xe1b   :  { %3174 = vmatprep.mubr.msk.f32.mxu1 %vm51_vm0, %v1355_v0 }
 0xe1c   :  { %3175 = vmatmul.mubr.msk.f32.vlgmr.msra.gmra.mrb[18].mxu1 %vm51_vm0, %v1356_v2 }
 0xeef   :  { %v3176_v9 = vpop.f32.mrb[18].mxu1 }
 0xef0   :  { %v1439_v10 = vadd.f32 %v3176_v9, %v1360_v8  ;;  %v1433_v6 = vpop.f32.mrb[19].mxu1 }
 0xef1   :  { %v1434_v16 = vadd.f32 %v1433_v6, %v1360_v8 }
 0xef2   :  { %v4155_v17 = vadd.f32 %v1439_v10, %v4086_v46 }
 0xef3   :  { %v4158_v18 = vadd.f32 %v1434_v16, %v4088_v47 }
 0xef4   :  { %v1466_v19 = vsel %vm171_vm1, %v4155_v17, 0.0 }
 0xef5   :  { %1467 = vadd.xlane.f32.xlu1 %v1466_v19  ;;  %v1463_v20 = vsel %vm171_vm1, %v4158_v18, 0.0 }
 0xef6   :  { %1464 = vadd.xlane.f32.xlu0 %v1463_v20 }
 0xf82   :  { %v1468_v21 = vpop.xlane.xlu1 %1467 }
 0xf83   :  { %v1470_v14 = vmul.f32 0.03125, %v1468_v21  ;;  %v1465_v22 = vpop.xlane.xlu0 %1464 }
 0xf84   :  { %v1469_v23 = vmul.f32 0.03125, %v1465_v22 }
 0xf85   :  { %v1472_v24 = vsub.f32 %v4155_v17, %v1470_v14 }
 0xf86   :  { %v1471_v46 = vsub.f32 %v4158_v18, %v1469_v23 }
 0xf87   :  { %v1474_v28 = vmul.f32 %v1472_v24, %v1472_v24 }
 0xf88   :  { %v1473_v30 = vmul.f32 %v1471_v46, %v1471_v46 }
 0xf89   :  { %v1478_v47 = vsel %vm171_vm1, %v1474_v28, 0.0 }
 0xf8a   :  { %1479 = vadd.xlane.f32.xlu1 %v1478_v47  ;;  %v1475_v33 = vsel %vm171_vm1, %v1473_v30, 0.0 }
 0xf8b   :  { %1476 = vadd.xlane.f32.xlu0 %v1475_v33 }
0x1017   :  { %v1480_v31 = vpop.xlane.xlu1 %1479 }
0x1018   :  { %v1482_v41 = vmul.f32 0.03125, %v1480_v31  ;;  %v1477_v27 = vpop.xlane.xlu0 %1476 }
0x1019   :  { %v1481_v25 = vmul.f32 0.03125, %v1477_v27 }
0x101a   :  { %v1484_v44 = vadd.f32 1e-12, %v1482_v41 }
0x101b   :  { %v1483_v45 = vadd.f32 1e-12, %v1481_v25 }
0x101c   :  { %3664 = vrsqrt.f32 %v1484_v44 }
0x101d   :  { %3666 = vrsqrt.f32 %v1483_v45 }
0x1026   :  { %v3665_v51 = vpop.eup %3664 }
0x1027   :  { %v3667_v52 = vpop.eup %3666  ;;  %v1488_v54 = vmul.f32 %v3665_v51, %v1472_v24 }
0x1028   :  { %v1487_v48 = vmul.f32 %v3667_v52, %v1471_v46 }
0x1029   :  { %v1494_v43 = vmul.f32 %v1492_v50, %v1488_v54 }
0x102a   :  { %v1493_v55 = vmul.f32 %v1492_v50, %v1487_v48 }
0x102b   :  { %v1500_v56 = vadd.f32 %v1498_v53, %v1494_v43 }
0x102c   :  { %v1499_v58 = vadd.f32 %v1498_v53, %v1493_v55 }
0x102e   :  { %3185 = vmatprep.mubr.msk.f32.mxu0 %vm171_vm1, %v1499_v58 }
0x102f   :  { %3186 = vmatmul.mubr.msk.f32.vlgmr.msra.gmra.mrb[8].mxu0 %vm171_vm1, %v1500_v56 }
0x1102   :  { %v3187_v59 = vpop.f32.mrb[8].mxu0 }
0x1103   :  { %v4208_v1 = vadd.f32 %v3187_v59, %v1504_v13  ;;  %v1577_v4 = vpop.f32.mrb[9].mxu0 }
0x1104   :  { %v4210_v5 = vadd.f32 %v1577_v4, %v1504_v13 }
0x1106   :  { %3192 = vmatprep.mubr.msk.f32.mxu0 %vm302_vm2, %v4210_v5  ;;  %v4216_v15 = vpack.i.bf16 %v4208_v1, %v4210_v5 }
0x1108   :  { %3576 = vrot.lane.b32.xlu1 %v4216_v15, %s3737_s14  ;;  %3571 = vrot.lane.b32.xlu0 %v4216_v15, %s3736_s13 }
0x110c   :  { %1780 = vrot.lane.b32.xlu1 %v4210_v5, %s3738_s15 }
0x1110   :  { %1782 = vrot.lane.b32.xlu1 %v4208_v1, %s3738_s15 }
0x117a   :  { %v3577_v26 = vpop.permute.xlu1 %3576  ;;  %v3572_v61 = vpop.permute.xlu0 %3571 }
0x117b   :  { %v3579_v62 = vunpack.i.h.bf16 %v3577_v26  ;;  %v3578_v63 = vunpack.i.l.bf16 %v3577_v26  ;;  %v3574_v0 = vunpack.i.h.bf16 %v3572_v61  ;;  %v3573_v2 = vunpack.i.l.bf16 %v3572_v61 }
0x117d   :  { %v3420_v8 = vpack.c.bf16 %v3574_v0, %v3573_v2  ;;  %v3430_v9 = vpack.c.bf16 %v3579_v62, %v3578_v63 }
0x117e   :  { %v1781_v10 = vpop.permute.xlu1 %1780 }
0x117f   :  { %3422 = vmatprep.subr.msk.bf16.mxu0 %vm3969_vm3, %v3420_v8 }
0x1180   :  { %3425 = vmatpush3.bf16.xpose.msk.msra.mxu0 %vm3969_vm3, %v3420_v8 }
0x1181   :  { %3432 = vmatprep.subr.msk.bf16.mxu0 %vm3969_vm3, %v3430_v9 }
0x1182   :  { %v1783_v6 = vpop.permute.xlu1 %1782 }
0x1187   :  { %3193 = vmatmul.mubr.msk.f32.vlgmr.msra.gmra.mrb[10].mxu0 %vm302_vm2, %v4208_v1 }
0x1188   :  { %3435 = vmatpush3.bf16.xpose.msk.msra.mxu0 %vm3969_vm3, %v3430_v9  ;;  %3206 = vmatprep.mubr.msk.f32.mxu0 %vm302_vm2, %v1781_v10 }
0x118f   :  { %3207 = vmatmul.mubr.msk.f32.vlgmr.msra.gmra.mrb[12].mxu0 %vm302_vm2, %v1783_v6 }
0x125a   :  { %v3194_v16 = vpop.f32.mrb[10].mxu0 }
0x125b   :  { %v1676_v19 = vmul.f32 0.35355338, %v3194_v16  ;;  %v1666_v20 = vpop.f32.mrb[11].mxu0 }
0x125c   :  { %v1675_v21 = vmul.f32 0.35355338, %v1666_v20 }
0x125d   :  { %v1678_v14 = vadd.f32 %v1676_v19, %v3983_v57 }
0x125e   :  { %v1677_v22 = vadd.f32 %v1675_v21, %v3985_v60 }
0x125f   :  { %v1681_v23 = vmul.f32 1.442695, %v1678_v14 }
0x1260   :  { %v1679_v24 = vmul.f32 1.442695, %v1677_v22 }
0x1261   :  { %3668 = vpow2.f32 %v1681_v23 }
0x1262   :  { %3670 = vpow2.f32 %v1679_v24  ;;  %v3208_v46 = vpop.f32.mrb[12].mxu0 }
0x1263   :  { %v1872_v28 = vmul.f32 0.35355338, %v3208_v46  ;;  %v1862_v30 = vpop.f32.mrb[13].mxu0 }
0x1264   :  { %v1871_v47 = vmul.f32 0.35355338, %v1862_v30 }
0x1265   :  { %v1874_v33 = vadd.f32 %v1872_v28, %v3983_v57 }
0x1266   :  { %v1873_v36 = vadd.f32 %v1871_v47, %v3985_v60 }
0x1267   :  { %v1877_v40 = vmul.f32 1.442695, %v1874_v33 }
0x1268   :  { %v1875_v31 = vmul.f32 1.442695, %v1873_v36 }
0x1269   :  { %3672 = vpow2.f32 %v1877_v40 }
0x126a   :  { %3674 = vpow2.f32 %v1875_v31 }
0x126b   :  { %v3669_v41 = vpop.eup %3668 }
0x126c   :  { %v3671_v27 = vpop.eup %3670  ;;  %v1686_v25 = vsel %vm394_vm10, %v3669_v41, 0.0 }
0x126d   :  { %1687 = vadd.xlane.f32.xlu1 %v1686_v25  ;;  %v1683_v44 = vsel %vm394_vm10, %v3671_v27, 0.0 }
0x126e   :  { %1684 = vadd.xlane.f32.xlu0 %v1683_v44 }
0x1273   :  { %v3673_v45 = vpop.eup %3672 }
0x1274   :  { %v1882_v50 = vsel %vm394_vm10, %v3673_v45, 0.0  ;;  %v3675_v51 = vpop.eup %3674 }
0x1275   :  { %1883 = vadd.xlane.f32.xlu0 %v1882_v50  ;;  %v1879_v52 = vsel %vm394_vm10, %v3675_v51, 0.0 }
0x1279   :  { %1880 = vadd.xlane.f32.xlu0 %v1879_v52 }
0x127e   :  { %3586 = vrot.lane.b32.xlu1 %v4216_v15, %s3744_s18 }
0x1282   :  { %3591 = vrot.lane.b32.xlu1 %v4216_v15, %s3742_s16 }
0x1286   :  { %1976 = vrot.lane.b32.xlu1 %v4210_v5, %s3743_s17 }
0x128a   :  { %3601 = vrot.lane.b32.xlu1 %v4216_v15, %s3745_s19 }
0x128f   :  { %3581 = vrot.lane.b32.xlu0 %v4216_v15, %s3735_s12 }
0x1293   :  { %1978 = vrot.lane.b32.xlu0 %v4208_v1, %s3743_s17 }
0x12fa   :  { %v1688_v54 = vpop.xlane.xlu1 %1687 }
0x12fb   :  { %v1685_v53 = vpop.xlane.xlu0 %1684 }
0x12fc   :  { %3676 = vrcp.f32 %v1685_v53 }
0x12fd   :  { %3678 = vrcp.f32 %v1688_v54 }
0x12fe   :  { %v3587_v55 = vpop.permute.xlu1 %3586 }
0x12ff   :  { %v3589_v59 = vunpack.i.h.bf16 %v3587_v55  ;;  %v3588_v4 = vunpack.i.l.bf16 %v3587_v55 }
0x1301   :  { %v3436_v2 = vpack.c.bf16 %v3589_v59, %v3588_v4 }
0x1302   :  { %v1884_v48 = vpop.xlane.xlu0 %1883  ;;  %v3592_v62 = vpop.permute.xlu1 %3591 }
0x1303   :  { %v3594_v8 = vunpack.i.h.bf16 %v3592_v62  ;;  %v3593_v9 = vunpack.i.l.bf16 %v3592_v62 }
0x1305   :  { %v3440_v20 = vpack.c.bf16 %v3594_v8, %v3593_v9 }
0x1306   :  { %v3677_v43 = vpop.eup %3676  ;;  %v1881_v56 = vpop.xlane.xlu0 %1880 }
0x1307   :  { %3680 = vrcp.f32 %v1881_v56  ;;  %v1691_v58 = vmul.f32 %v3677_v43, %v3671_v27  ;;  %v3679_v0 = vpop.eup %3678  ;;  %v1977_v14 = vpop.permute.xlu1 %1976 }
0x1308   :  { %3682 = vrcp.f32 %v1884_v48  ;;  %v1692_v6 = vmul.f32 %v3679_v0, %v3669_v41 }
0x1309   :  { %3199 = vmatprep.mubr.msk.f32.mxu1 %vm394_vm10, %v1691_v58 }
0x130a   :  { %v3582_v13 = vpop.permute.xlu0 %3581 }
0x130b   :  { %v3584_v26 = vunpack.i.h.bf16 %v3582_v13  ;;  %v3583_v61 = vunpack.i.l.bf16 %v3582_v13 }
0x130d   :  { %v3426_v63 = vpack.c.bf16 %v3584_v26, %v3583_v61 }
0x130e   :  { %v1979_v22 = vpop.permute.xlu0 %1978 }
0x130f   :  { %3427 = vmatprep.subr.bf16.mxu1 %v3426_v63 }
0x1310   :  { %3429 = vmatpush3.bf16.msra.mxu1 %v3426_v63 }
0x1311   :  { %v3681_v10 = vpop.eup %3680  ;;  %3437 = vmatprep.subr.bf16.mxu1 %v3436_v2 }
0x1312   :  { %v3683_v16 = vpop.eup %3682  ;;  %v1887_v19 = vmul.f32 %v3681_v10, %v3675_v51  ;;  %v3602_v51 = vpop.permute.xlu1 %3601 }
0x1313   :  { %3200 = vmatmul.mubr.msk.f32.vlgmr.msra.gmra.mrb[20].mxu1 %vm394_vm10, %v1692_v6  ;;  %v1888_v21 = vmul.f32 %v3683_v16, %v3673_v45  ;;  %v3604_v48 = vunpack.i.h.bf16 %v3602_v51  ;;  %v3603_v43 = vunpack.i.l.bf16 %v3602_v51 }
0x1314   :  { %3439 = vmatpush3.bf16.msra.mxu1 %v3436_v2  ;;  %3213 = vmatprep.mubr.msk.f32.mxu1 %vm394_vm10, %v1887_v19 }
0x1315   :  { %3442 = vmatprep.subr.msk.bf16.mxu1 %vm3969_vm3, %v3440_v20  ;;  %v3450_v13 = vpack.c.bf16 %v3604_v48, %v3603_v43 }
0x1317   :  { %3214 = vmatmul.mubr.msk.f32.vlgmr.msra.gmra.mrb[22].mxu1 %vm394_vm10, %v1888_v21 }
0x1318   :  { %3220 = vmatprep.mubr.msk.f32.mxu1 %vm302_vm2, %v1977_v14 }
0x131d   :  { %3445 = vmatpush3.bf16.xpose.msk.msra.mxu1 %vm3969_vm3, %v3440_v20 }
0x1324   :  { %3221 = vmatmul.mubr.msk.f32.vlgmr.msra.gmra.mrb[24].mxu1 %vm302_vm2, %v1979_v22  ;;  %v3610_v22 = vpack.i.bf16 %v4176_v35, %v4171_v34 }
0x13e6   :  { %v4268_v23 = vpop.f32.mrb[20].mxu1 }
0x13e7   :  { %v4270_v24 = vpop.f32.mrb[21].mxu1 }
0x13ea   :  { %v4272_v46 = vpop.f32.mrb[22].mxu1 }
0x13eb   :  { %v4274_v28 = vpop.f32.mrb[23].mxu1 }
0x13f7   :  { %v3222_v30 = vpop.f32.mrb[24].mxu1 }
0x13f8   :  { %v2068_v47 = vmul.f32 0.35355338, %v3222_v30  ;;  %v2058_v33 = vpop.f32.mrb[25].mxu1 }
0x13f9   :  { %v2067_v36 = vmul.f32 0.35355338, %v2058_v33 }
0x13fa   :  { %v2070_v40 = vadd.f32 %v2068_v47, %v3983_v57 }
0x13fb   :  { %v2069_v31 = vadd.f32 %v2067_v36, %v3985_v60 }
0x13fc   :  { %v2073_v41 = vmul.f32 1.442695, %v2070_v40 }
0x13fd   :  { %v2071_v27 = vmul.f32 1.442695, %v2069_v31 }
0x13fe   :  { %3684 = vpow2.f32 %v2073_v41 }
0x13ff   :  { %3686 = vpow2.f32 %v2071_v27 }
0x1408   :  { %v3685_v25 = vpop.eup %3684 }
0x1409   :  { %v3687_v44 = vpop.eup %3686  ;;  %v2078_v45 = vsel %vm394_vm10, %v3685_v25, 0.0 }
0x140a   :  { %2079 = vadd.xlane.f32.xlu0 %v2078_v45  ;;  %v2075_v50 = vsel %vm394_vm10, %v3687_v44, 0.0 }
0x140b   :  { %2076 = vadd.xlane.f32.xlu1 %v2075_v50 }
0x141c   :  { %2172 = vrot.lane.b32.xlu1 %v4210_v5, %s3746_s20 }
0x1420   :  { %3596 = vrot.lane.b32.xlu0 %v4216_v15, %s3747_s21  ;;  %s3755_s21 = smov [#allocation2]  }
0x1424   :  { %2174 = vrot.lane.b32.xlu0 %v4208_v1, %s3746_s20 }
0x1497   :  { %v2080_v52 = vpop.xlane.xlu0 %2079 }
0x1498   :  { %3688 = vrcp.f32 %v2080_v52  ;;  %v2077_v53 = vpop.xlane.xlu1 %2076 }
0x1499   :  { %3690 = vrcp.f32 %v2077_v53 }
0x149b   :  { %v3597_v54 = vpop.permute.xlu0 %3596 }
0x149c   :  { %v3599_v55 = vunpack.i.h.bf16 %v3597_v54  ;;  %v3598_v56 = vunpack.i.l.bf16 %v3597_v54  ;;  %v2173_v26 = vpop.permute.xlu1 %2172 }
0x149e   :  { %v3446_v58 = vpack.c.bf16 %v3599_v55, %v3598_v56 }
0x149f   :  { %v2175_v61 = vpop.permute.xlu0 %2174 }
0x14a0   :  { %3447 = vmatprep.subr.bf16.mxu0 %v3446_v58 }
0x14a1   :  { %3449 = vmatpush3.bf16.msra.mxu0 %v3446_v58 }
0x14a2   :  { %v3689_v5 = vpop.eup %3688  ;;  %3452 = vmatprep.subr.msk.bf16.mxu0 %vm3969_vm3, %v3450_v13 }
0x14a3   :  { %v3691_v59 = vpop.eup %3690  ;;  %v2084_v4 = vmul.f32 %v3689_v5, %v3685_v25 }
0x14a4   :  { %v2083_v1 = vmul.f32 %v3691_v59, %v3687_v44 }
0x14a6   :  { %3227 = vmatprep.mubr.msk.f32.mxu0 %vm394_vm10, %v2083_v1 }
0x14a7   :  { %3228 = vmatmul.mubr.msk.f32.vlgmr.msra.gmra.mrb[14].mxu0 %vm394_vm10, %v2084_v4 }
0x14a8   :  { %3234 = vmatprep.mubr.msk.f32.mxu0 %vm302_vm2, %v2173_v26 }
0x14aa   :  { %3455 = vmatpush3.bf16.xpose.msk.msra.mxu0 %vm3969_vm3, %v3450_v13 }
0x14b1   :  { %3235 = vmatmul.mubr.msk.f32.vlgmr.msra.gmra.mrb[16].mxu0 %vm302_vm2, %v2175_v61 }
0x157a   :  { %v3229_v62 = vpop.f32.mrb[14].mxu0 }
0x157b   :  { %v2163_v63 = vpop.f32.mrb[15].mxu0 }
0x1584   :  { %v3236_v0 = vpop.f32.mrb[16].mxu0 }
0x1585   :  { %v2264_v2 = vmul.f32 0.35355338, %v3236_v0  ;;  %v2254_v8 = vpop.f32.mrb[17].mxu0 }
0x1586   :  { %v2263_v9 = vmul.f32 0.35355338, %v2254_v8 }
0x1587   :  { %v2266_v10 = vadd.f32 %v2264_v2, %v3983_v57  ;;  %v3615_v57 = vpack.i.bf16 %v4188_v38, %v4183_v37 }
0x1588   :  { %v2265_v6 = vadd.f32 %v2263_v9, %v3985_v60 }
0x1589   :  { %v2269_v16 = vmul.f32 1.442695, %v2266_v10 }
0x158a   :  { %v2267_v19 = vmul.f32 1.442695, %v2265_v6 }
0x158b   :  { %3692 = vpow2.f32 %v2269_v16 }
0x158c   :  { %3694 = vpow2.f32 %v2267_v19 }
0x1595   :  { %v3693_v20 = vpop.eup %3692 }
0x1596   :  { %v3695_v39 = vpop.eup %3694  ;;  %v2274_v21 = vsel %vm394_vm10, %v3693_v20, 0.0 }
0x1597   :  { %2275 = vadd.xlane.f32.xlu0 %v2274_v21  ;;  %v2271_v14 = vsel %vm394_vm10, %v3695_v39, 0.0 }
0x1598   :  { %2272 = vadd.xlane.f32.xlu1 %v2271_v14  ;;  %v2896_v14 = vld [vmem:[%s4429_s1 + $0xe8] sm:$0xff] }
0x15a9   :  { %3611 = vrot.lane.b32.xlu1 %v3610_v22, %s3748_s22  ;;  %v2898_v22 = vld [vmem:[%s4429_s1 + $0xf8] sm:$0xff] }
0x15ad   :  { %3606 = vrot.lane.b32.xlu0 %v4216_v15, %s3749_s23  ;;  %3616 = vrot.lane.b32.xlu1 %v3615_v57, %s3748_s22  ;;  %v3472_v57 = vpack.c.bf16 %v2898_v22, %v2896_v14  ;;  %s2849_s22 = sshll.u32 %s3755_s21, 4  ;;  %s2850_s22 = int_to_ptr.vmem [resolvable:$true] %s2849_s22 }
0x15ae   :  { %s3710_s23 = scalar_lea.vmem %s2850_s22, 32  ;;  %p3715_p1 = scmp.lt.s32.totalorder %s2850_s22, %s2850_s22 }
0x15af   :  { %p3711_p0 = scmp.ne.s32.totalorder %s2850_s22, %s3710_s23  ;;  %p3716_p2 = scmp.lt.s32.totalorder %s3710_s23, %s3710_s23 }
0x15b1   :  { %2370 = vrot.lane.b32.xlu0 %v4274_v28, %s3750_s24  ;;  %2372 = vrot.lane.b32.xlu1 %v4272_v46, %s3750_s24  ;;  %p3717_p3 = por %p3716_p2, %p3715_p1 }
0x15b3   :  { %p3718_p4 = pnand %p3717_p3, %p3711_p0 }
0x15b5   :  { %2378 = vrot.lane.b32.xlu0 %v2163_v63, %s3751_s25  ;;  %2380 = vrot.lane.b32.xlu1 %v3229_v62, %s3751_s25 }
0x1624   :  { %v2276_v60 = vpop.xlane.xlu0 %2275 }
0x1625   :  { %3696 = vrcp.f32 %v2276_v60  ;;  %v2273_v34 = vpop.xlane.xlu1 %2272 }
0x1626   :  { %3698 = vrcp.f32 %v2273_v34 }
0x1628   :  { %v3607_v35 = vpop.permute.xlu0 %3606 }
0x1629   :  { %v3609_v37 = vunpack.i.h.bf16 %v3607_v35  ;;  %v3608_v38 = vunpack.i.l.bf16 %v3607_v35  ;;  %v3612_v15 = vpop.permute.xlu1 %3611 }
0x162a   :  { %v3614_v30 = vunpack.i.h.bf16 %v3612_v15  ;;  %v3613_v47 = vunpack.i.l.bf16 %v3612_v15 }
0x162b   :  { %v3456_v33 = vpack.c.bf16 %v3609_v37, %v3608_v38 }
0x162c   :  { %v3460_v36 = vpack.c.bf16 %v3614_v30, %v3613_v47  ;;  %v2371_v52 = vpop.permute.xlu0 %2370  ;;  %v2532_v30 = vrot.slane %v4195_v49, %v1244_v7  ;;  %v2899_v7 = vld [vmem:[%s4429_s1 + $0x100] sm:$0xff] }
0x162d   :  { %3457 = vmatprep.subr.bf16.mxu1 %v3456_v33  ;;  %v3617_v28 = vpop.permute.xlu1 %3616  ;;  %v2392_v48 = vsel %vm302_vm2, %v4270_v24, %v2371_v52  ;;  %v2500_v24 = vrot.slane %v4195_v49, %v1212_v29  ;;  %v2904_v52 = vld [vmem:[%s4429_s1 + $0x150] sm:$0xff] }
0x162e   :  { %v3619_v40 = vunpack.i.h.bf16 %v3617_v28  ;;  %v3618_v46 = vunpack.i.l.bf16 %v3617_v28  ;;  %3459 = vmatpush3.bf16.msra.mxu1 %v3456_v33 }
0x162f   :  { %v3697_v31 = vpop.eup %3696  ;;  %3461 = vmatprep.subr.bf16.mxu1 %v3460_v36 }
0x1630   :  { %v3699_v41 = vpop.eup %3698  ;;  %v2280_v25 = vmul.f32 %v3697_v31, %v3693_v20  ;;  %v3464_v44 = vpack.c.bf16 %v3619_v40, %v3618_v46  ;;  %v2379_v54 = vpop.permute.xlu0 %2378  ;;  %v2892_v20 = vld [vmem:[%s4429_s1 + $0xc8] sm:$0xff] }
0x1631   :  { %v2279_v27 = vmul.f32 %v3699_v41, %v3695_v39  ;;  %v2373_v51 = vpop.permute.xlu1 %2372  ;;  %v2394_v55 = vsel %vm394_vm10, %v2392_v48, %v2379_v54  ;;  %v2894_v39 = vld [vmem:[%s4429_s1 + $0xd8] sm:$0xff]  ;;  %v2905_v54 = vld [vmem:[%s4429_s1 + $0x160] sm:$0xff]  ;;  %v2906_v48 = vld [vmem:[%s4429_s1 + $0x170] sm:$0xff] }
0x1632   :  { %v2393_v56 = vsel %vm302_vm2, %v4268_v23, %v2373_v51  ;;  %v3468_v21 = vpack.c.bf16 %v2894_v39, %v2892_v20  ;;  %v2903_v51 = vld [vmem:[%s4429_s1 + $0x140] sm:$0xff] }
0x1633   :  { %3241 = vmatprep.mubr.msk.f32.mxu1 %vm394_vm10, %v2279_v27 }
0x1634   :  { %3242 = vmatmul.mubr.msk.f32.vlgmr.msra.gmra.mrb[26].mxu1 %vm394_vm10, %v2280_v25  ;;  %3469 = vmatprep.subr.bf16.mxu0 %v3468_v21  ;;  %v2900_v25 = vld [vmem:[%s4429_s1 + $0x110] sm:$0xff] }
0x1635   :  { %3463 = vmatpush3.bf16.msra.mxu1 %v3460_v36  ;;  %v2381_v53 = vpop.permute.xlu1 %2380  ;;  %3471 = vmatpush3.bf16.msra.mxu0 %v3468_v21  ;;  %v2538_v36 = vrot.slane %v4195_v49, %v1250_v12  ;;  %v2901_v12 = vld [vmem:[%s4429_s1 + $0x120] sm:$0xff] }
0x1636   :  { %3465 = vmatprep.subr.bf16.mxu1 %v3464_v44  ;;  %v2395_v13 = vsel %vm394_vm10, %v2393_v56, %v2381_v53  ;;  %3473 = vmatprep.subr.bf16.mxu0 %v3472_v57  ;;  %v3484_v53 = vpack.c.bf16 %v2904_v52, %v2903_v51 }
0x1639   :  { %3467 = vmatpush3.bf16.msra.mxu1 %v3464_v44  ;;  %3475 = vmatpush3.bf16.msra.mxu0 %v3472_v57  ;;  %v3476_v44 = vpack.c.bf16 %v2900_v25, %v2899_v7  ;;  %v2942_v7 = vld [vmem:[%s4432_s4 + $0x20] ss:$0 sm:$0xff] }
0x163a   :  { %3492 = vmatprep.subr.bf16.mxu0 %v3734_v3 }
0x163b   :  { %3477 = vmatprep.subr.bf16.mxu1 %v3476_v44 }
0x1707   :  { %v3243_v45 = vpop.f32.mrb[26].mxu1 }
0x1708   :  { %2388 = vrot.lane.b32.xlu1 %v3243_v45, %s3752_s26  ;;  %v2359_v50 = vpop.f32.mrb[27].mxu1  ;;  %v2902_v45 = vld [vmem:[%s4429_s1 + $0x130] sm:$0xff] }
0x1709   :  { %2386 = vrot.lane.b32.xlu0 %v2359_v50, %s3752_s26  ;;  %v3480_v50 = vpack.c.bf16 %v2902_v45, %v2901_v12 }
0x177a   :  { %v2389_v43 = vpop.permute.xlu1 %2388 }
0x177b   :  { %v2387_v58 = vpop.permute.xlu0 %2386  ;;  %v2397_v59 = vsel %vm1108_vm11, %v2395_v13, %v2389_v43  ;;  %v3488_v43 = vpack.c.bf16 %v2906_v48, %v2905_v54 }
0x177c   :  { %v2396_v5 = vsel %vm1108_vm11, %v2394_v55, %v2387_v58  ;;  %v2544_v55 = vrot.slane %v4195_v49, %v1256_v42 }
0x177d   :  { %3252 = vmatprep.mubr.msk.f32.mxu1 %vm171_vm1, %v2396_v5 }
0x177e   :  { %3253 = vmatmul.mubr.msk.f32.vlgmr.msra.gmra.mrb[28].mxu1 %vm171_vm1, %v2397_v59 }
0x177f   :  { %3479 = vmatpush3.bf16.msra.mxu1 %v3476_v44 }
0x1780   :  { %3481 = vmatprep.subr.bf16.mxu1 %v3480_v50 }
0x1783   :  { %3483 = vmatpush3.bf16.msra.mxu1 %v3480_v50 }
0x1784   :  { %3485 = vmatprep.subr.bf16.mxu1 %v3484_v53 }
0x1787   :  { %3487 = vmatpush3.bf16.msra.mxu1 %v3484_v53 }
0x1788   :  { %3489 = vmatprep.subr.bf16.mxu1 %v3488_v43 }
0x178b   :  { %3491 = vmatpush3.bf16.msra.mxu1 %v3488_v43 }
0x1851   :  { %v3254_v1 = vpop.f32.mrb[28].mxu1 }
0x1852   :  { %v2496_v4 = vadd.f32 %v3254_v1, %v4155_v17  ;;  %v2486_v26 = vpop.f32.mrb[29].mxu1 }
0x1853   :  { %v2495_v23 = vadd.f32 %v2486_v26, %v4158_v18 }
0x1854   :  { %v2502_v61 = vadd.f32 %v2500_v24, %v2496_v4 }
0x1855   :  { %v4331_v62 = vadd.f32 %v2500_v24, %v2495_v23 }
0x1856   :  { %v2506_v63 = vsel %vm171_vm1, %v2502_v61, 0.0 }
0x1857   :  { %2507 = vadd.xlane.f32.xlu1 %v2506_v63  ;;  %v2503_v0 = vsel %vm171_vm1, %v4331_v62, 0.0 }
0x1858   :  { %2504 = vadd.xlane.f32.xlu0 %v2503_v0 }
0x18e4   :  { %v2508_v2 = vpop.xlane.xlu1 %2507 }
0x18e5   :  { %v2510_v8 = vmul.f32 0.03125, %v2508_v2  ;;  %v2505_v9 = vpop.xlane.xlu0 %2504 }
0x18e6   :  { %v2509_v29 = vmul.f32 0.03125, %v2505_v9 }
0x18e7   :  { %v2512_v10 = vsub.f32 %v2502_v61, %v2510_v8 }
0x18e8   :  { %v2511_v17 = vsub.f32 %v4331_v62, %v2509_v29 }
0x18e9   :  { %v2514_v16 = vmul.f32 %v2512_v10, %v2512_v10 }
0x18ea   :  { %v2513_v6 = vmul.f32 %v2511_v17, %v2511_v17 }
0x18eb   :  { %v2518_v19 = vsel %vm171_vm1, %v2514_v16, 0.0  ;;  %v2647_v16 = vrot.slane %v4195_v49, %v1359_v32  ;;  %v2761_v32 = vld [vmem:[%s4432_s4 + $0x8] sm:$0xff] }
0x18ec   :  { %v2515_v18 = vsel %vm171_vm1, %v2513_v6, 0.0  ;;  %v3493_v49 = vpack.c.bf16 %v2761_v32, %v2760_v11 }
0x18ed   :  { %2516 = vadd.xlane.f32.xlu0 %v2515_v18 }
0x18f1   :  { %2519 = vadd.xlane.f32.xlu0 %v2518_v19 }
0x197a   :  { %v2517_v60 = vpop.xlane.xlu0 %2516 }
0x197b   :  { %v2521_v34 = vmul.f32 0.03125, %v2517_v60 }
0x197d   :  { %v2523_v35 = vadd.f32 1e-12, %v2521_v34 }
0x197e   :  { %v2520_v37 = vpop.xlane.xlu0 %2519 }
0x197f   :  { %3700 = vrsqrt.f32 %v2523_v35  ;;  %v2522_v38 = vmul.f32 0.03125, %v2520_v37 }
0x1981   :  { %v2524_v15 = vadd.f32 1e-12, %v2522_v38 }
0x1983   :  { %3702 = vrsqrt.f32 %v2524_v15  ;;  %v2763_v15 = vld [vmem:[%s4432_s4 + $0x18] sm:$0xff] }
0x1989   :  { %v3701_v47 = vpop.eup %3700 }
0x198a   :  { %v2527_v33 = vmul.f32 %v3701_v47, %v2511_v17  ;;  %v3754_v47 = vmov 0.0  }
0x198c   :  { %v2533_v28 = vmul.f32 %v2532_v30, %v2527_v33 }
0x198d   :  { %v3703_v40 = vpop.eup %3702 }
0x198e   :  { %v2528_v46 = vmul.f32 %v3703_v40, %v2512_v10  ;;  %v2539_v31 = vadd.f32 %v2538_v36, %v2533_v28 }
0x1990   :  { %v2534_v41 = vmul.f32 %v2532_v30, %v2528_v46  ;;  %3263 = vmatprep.mubr.msk.f32.mxu0 %vm171_vm1, %v2539_v31  ;;  %v2941_v31 = vld [vmem:[%s4431_s3 + $0xd1] ss:$0 sm:$0xff] }
0x1992   :  { %v2540_v27 = vadd.f32 %v2538_v36, %v2534_v41 }
0x1994   :  { %3264 = vmatmul.mubr.msk.f32.vlgmr.msra.gmra.mrb[18].mxu0 %vm171_vm1, %v2540_v27 }
0x1995   :  { %3494 = vmatpush3.bf16.msra.mxu0 %v3493_v49  ;;  %3293 = vmatprep.mubr.msk.f32.mxu0 %vm3753_vm14, %v3754_v47 }
0x1996   :  { %3495 = vmatprep.subr.bf16.mxu0 %v3734_v3  ;;  %v2940_v3 = vld [vmem:[%s4431_s3 + $0xd0] ss:$0 sm:$0xff] }
0x1a67   :  { %v3265_v56 = vpop.f32.mrb[18].mxu0 }
0x1a68   :  { %v2623_v58 = vadd.f32 %v3265_v56, %v2544_v55  ;;  %v2617_v13 = vpop.f32.mrb[19].mxu0 }
0x1a69   :  { %v2618_v5 = vadd.f32 %v2617_v13, %v2544_v55 }
0x1a6a   :  { %v2627_v59 = vmul.f32 %v2623_v58, %v2623_v58 }
0x1a6b   :  { %v2626_v24 = vmul.f32 %v2618_v5, %v2618_v5 }
0x1a6c   :  { %v2629_v1 = vmul.f32 %v2627_v59, %v2623_v58 }
0x1a6d   :  { %v2628_v4 = vmul.f32 %v2626_v24, %v2618_v5 }
0x1a6e   :  { %v2631_v26 = vmul.f32 0.044715, %v2629_v1 }
0x1a6f   :  { %v2630_v23 = vmul.f32 0.044715, %v2628_v4 }
0x1a70   :  { %v2633_v61 = vadd.f32 %v2631_v26, %v2623_v58 }
0x1a71   :  { %v2632_v63 = vadd.f32 %v2630_v23, %v2618_v5 }
0x1a72   :  { %v2635_v0 = vmul.f32 0.7978846, %v2633_v61 }
0x1a73   :  { %v2634_v2 = vmul.f32 0.7978846, %v2632_v63 }
0x1a74   :  { %3704 = vtanh.f32 %v2635_v0 }
0x1a75   :  { %3706 = vtanh.f32 %v2634_v2 }
0x1a7e   :  { %v3705_v8 = vpop.eup %3704 }
0x1a7f   :  { %v3707_v9 = vpop.eup %3706  ;;  %v2639_v29 = vadd.f32 1.0, %v3705_v8 }
0x1a80   :  { %v2638_v42 = vadd.f32 1.0, %v3707_v9 }
0x1a81   :  { %v2641_v10 = vmul.f32 0.5, %v2639_v29 }
0x1a82   :  { %v2640_v17 = vmul.f32 0.5, %v2638_v42 }
0x1a83   :  { %v2643_v18 = vmul.f32 %v2641_v10, %v2623_v58 }
0x1a84   :  { %v2642_v6 = vmul.f32 %v2640_v17, %v2618_v5 }
0x1a86   :  { %3282 = vmatprep.mubr.msk.f32.mxu1 %vm51_vm0, %v2642_v6 }
0x1a87   :  { %3283 = vmatmul.mubr.msk.f32.vlgmr.msra.gmra.mrb[30].mxu1 %vm51_vm0, %v2643_v18 }
0x1b5a   :  { %v3284_v19 = vpop.f32.mrb[30].mxu1 }
0x1b5b   :  { %v2720_v20 = vpop.f32.mrb[31].mxu1 }
0x1b5c   :  { %v2721_v39 = vadd.f32 %v2720_v20, %v2647_v16 }
0x1b5e   :  { %v2728_v21 = vadd.f32 %v2721_v39, %v4331_v62  ;;  %v2762_v62 = vld [vmem:[%s4432_s4 + $0x10] sm:$0xff] }
0x1b5f   :  { %v3496_v30 = vpack.c.bf16 %v2763_v15, %v2762_v62 }
0x1b60   :  { %v2730_v14 = vrot.slane %v2728_v21, 4 }
0x1b61   :  { %3497 = vmatpush3.bf16.msra.mxu0 %v3496_v30 }
0x1b62   :  { %v2733_v22 = vsel %vm2732_vm12, %v2728_v21, %v2730_v14 }
0x1b63   :  { %v2737_v57 = vsel %vm2736_vm13, %v2733_v22, 0.0 }
0x1b64   :  { %2738 = vadd.xlane.f32.xlu0 %v2737_v57 }
0x1bf1   :  { %v2739_v60 = vpop.xlane.xlu0 %2738 }
0x1bf2   :  { %v2740_v34 = vmul.f32 0.03125, %v2739_v60 }
0x1bf4   :  { %v2741_v35 = vsub.f32 %v2733_v22, %v2740_v34 }
0x1bf6   :  { %v2742_v37 = vmul.f32 %v2741_v35, %v2741_v35 }
0x1bf8   :  { %v2743_v38 = vsel %vm2736_vm13, %v2742_v37, 0.0 }
0x1bf9   :  { %2744 = vadd.xlane.f32.xlu1 %v2743_v38 }
0x1c86   :  { %v2745_v33 = vpop.xlane.xlu1 %2744 }
0x1c87   :  { %v2746_v36 = vmul.f32 0.03125, %v2745_v33 }
0x1c89   :  { %v2747_v28 = vadd.f32 1e-12, %v2746_v36 }
0x1c8b   :  { %3708 = vrsqrt.f32 %v2747_v28 }
0x1c95   :  { %v3709_v40 = vpop.eup %3708 }
0x1c96   :  { %v2749_v46 = vmul.f32 %v3709_v40, %v2741_v35 }
0x1c98   :  { %v2754_v41 = vmul.f32 %v2940_v3, %v2749_v46 }
0x1c9a   :  { %v2759_v27 = vadd.f32 %v2941_v31, %v2754_v41 }
0x1c9c   :  { %3294 = vmatmul.mubr.msk.f32.vlgmr.msra.gmra.mrb[20].mxu0 %vm171_vm1, %v2759_v27 }
0x1d6f   :  { %v2838_v25 = vpop.f32.mrb[20].mxu0 }
0x1d70   :  { %v2839_v44 = vadd.f32 %v2942_v7, %v2838_v25  ;;  %v3295_v12 = vpop.f32.mrb[21].mxu0 }
0x1d72   :  { %2842 = vst [vmem:[#allocation2] sm:$0x3] %v2839_v44 }
0x1d73   :  { %3721 = shalt.err (!%p3718_p4)
}
0x1d74   :  { %s3722_s25 = scalar_lea.hbm %s4433_s5, 32 }
0x1d75   :  { %p3723_p5 = scmp.ne.s32.totalorder %s4433_s5, %s3722_s25  ;;  %p3726_p6 = scmp.lt.u32.totalorder %s3722_s25, %s4433_s5 }
0x1d77   :  { %p3728_p7 = pnand %p3726_p6, %p3723_p5 }
0x1d79   :  { %3731 = shalt.err (!%p3728_p7)
}
0x1d7a   :  { %2852 = dma.vmem_to_hbm [thread:$0]  %s2850_s22, 32, %s4433_s5, [#allocation3]  }
0x1d7b   :  { %3732 = dma.done.wait [#allocation3], 32  }
0x1d7c   :  { %3733 = vsyncadd [#allocation3], 4294967264 }
0x1d7d   :  { %2856 = vsyncpa [#allocation3], 1 }

</bundles_post_ra>
